<compile_context>
chip_gen: v7x
topology: tpu7x:2x2x1
jax: 0.10.0
libtpu: 0.0.40
codegen_flags: <defaults>
</compile_context>

<pallas_src>
import math

import jax
import jax.numpy as jnp
from jax.experimental import pallas as pl
from jax.experimental.pallas import tpu as pltpu

# Problem sizes (consistent with the module's forward).
BATCH = 2
NUM_ENSEMBLE = 8
DIM_X = 5
DIM_A = 2

N = BATCH * NUM_ENSEMBLE   # 16 rows
F = 128                    # padded feature width (lane axis)

# (in_features, out_features) of each LinearFlipout, in module order.
LAYER_DIMS = [
    (DIM_X, 64),   # bayes1
    (64, 128),     # bayes2
    (128, 64),     # bayes3
    (DIM_A, 64),   # bayes_a1
    (64, 128),     # bayes_a2
    (128, 64),     # bayes_a3
    (128, 64),     # bayes4  (input is concat(x, y) -> 128 features)
    (64, DIM_X),   # bayes5
]

N_WBLOCKS = 18   # 2 blocks per layer; bayes4 split into top/bottom halves -> 4
N_SIGNS = 17     # s_in + s_out per layer; bayes4 needs s_in_x, s_in_y, s_out

# Weight-slab block indices for each layer's W_mu / dW (layer 6 is special).
_WMU_BLOCK = [0, 2, 4, 6, 8, 10, None, 16]
_WDW_BLOCK = [1, 3, 5, 7, 9, 11, None, 17]


def process_model_action_kernel(state_ref, action_ref, w_ref, b_ref, s_ref, out_ref):
    """state/action: (N,128), w: (18,128,128), b: (16,128), s: (17,N,128)."""
    b = b_ref[...]  # (16, 128): rows 0..7 = b_mu per layer, rows 8..15 = db

    def flipout(x, wmu_idx, wdw_idx, layer, sin_idx, sout_idx):
        mean = jnp.dot(x, w_ref[wmu_idx],
                       preferred_element_type=jnp.float32) + b[layer:layer + 1, :]
        pert = jnp.dot(x * s_ref[sin_idx], w_ref[wdw_idx],
                       preferred_element_type=jnp.float32) + b[8 + layer:9 + layer, :]
        return mean + pert * s_ref[sout_idx]

    last_state = state_ref[...]
    action = action_ref[...]

    # State branch: bayes1 -> bayes2 -> bayes3 (ReLU after each).
    x = jnp.maximum(flipout(last_state, 0, 1, 0, 0, 1), 0.0)
    x = jnp.maximum(flipout(x, 2, 3, 1, 2, 3), 0.0)
    x = jnp.maximum(flipout(x, 4, 5, 2, 4, 5), 0.0)

    # Action branch: bayes_a1 -> bayes_a2 -> bayes_a3 (ReLU after each).
    y = jnp.maximum(flipout(action, 6, 7, 3, 6, 7), 0.0)
    y = jnp.maximum(flipout(y, 8, 9, 4, 8, 9), 0.0)
    y = jnp.maximum(flipout(y, 10, 11, 5, 10, 11), 0.0)

    # bayes4 on concat(x, y) WITHOUT the lane-axis concat: the (128, 64) weight
    # is pre-split into its top/bottom 64-row halves, so the concat becomes two
    # MXU accumulates (x hits rows 0:64, y hits rows 64:128).
    mean4 = (jnp.dot(x, w_ref[12], preferred_element_type=jnp.float32)
             + jnp.dot(y, w_ref[13], preferred_element_type=jnp.float32)
             + b[6:7, :])
    pert4 = (jnp.dot(x * s_ref[12], w_ref[14], preferred_element_type=jnp.float32)
             + jnp.dot(y * s_ref[13], w_ref[15], preferred_element_type=jnp.float32)
             + b[14:15, :])
    merge = mean4 + pert4 * s_ref[14]

    # bayes5 + residual update.  Padded lanes stay exactly zero (zero weight
    # columns / zero bias), so the (N,128) output is lane-dense and correct.
    update = flipout(merge, 16, 17, 7, 15, 16)
    out_ref[...] = last_state + update


def init_packed_params(key):
    """Deterministic LinearFlipout params packed into two zero-padded slabs."""
    sigma_init = math.log1p(math.exp(-3.0))  # softplus(rho = -3.0)
    w_slab = jnp.zeros((N_WBLOCKS, F, F), jnp.float32)
    b_slab = jnp.zeros((16, F), jnp.float32)

    for l, (fan_in, fan_out) in enumerate(LAYER_DIMS):
        key, k1, k2, k3, k4 = jax.random.split(key, 5)
        bound = 1.0 / math.sqrt(fan_in)
        w_mu = jax.random.uniform(k1, (fan_in, fan_out), jnp.float32, -bound, bound)
        b_mu = jax.random.uniform(k2, (fan_out,), jnp.float32, -bound, bound)
        dw = sigma_init * jax.random.normal(k3, (fan_in, fan_out), jnp.float32)
        db = sigma_init * jax.random.normal(k4, (fan_out,), jnp.float32)

        b_slab = b_slab.at[l, :fan_out].set(b_mu)
        b_slab = b_slab.at[8 + l, :fan_out].set(db)

        if l == 6:  # bayes4: split 128 input rows into top/bottom halves
            w_slab = w_slab.at[12, :64, :fan_out].set(w_mu[:64])
            w_slab = w_slab.at[13, :64, :fan_out].set(w_mu[64:])
            w_slab = w_slab.at[14, :64, :fan_out].set(dw[:64])
            w_slab = w_slab.at[15, :64, :fan_out].set(dw[64:])
        else:
            w_slab = w_slab.at[_WMU_BLOCK[l], :fan_in, :fan_out].set(w_mu)
            w_slab = w_slab.at[_WDW_BLOCK[l], :fan_in, :fan_out].set(dw)

    return w_slab, b_slab


def _process_model_action(last_state, action, w_slab, b_slab, sign_key):
    """last_state: (bs, k, dim_x), action: (bs, k, dim_a) -> (bs, k, dim_x)."""
    bs, k, dim_x = last_state.shape
    dim_a = action.shape[-1]
    n = bs * k

    state_pad = jnp.zeros((n, F), jnp.float32).at[:, :dim_x].set(
        last_state.reshape(n, dim_x).astype(jnp.float32))
    action_pad = jnp.zeros((n, F), jnp.float32).at[:, :dim_a].set(
        action.reshape(n, dim_a).astype(jnp.float32))

    # Flipout +/-1 sign matrices, one (n,128) slot per use (padded lanes only
    # ever multiply zeros, so their values are irrelevant).
    signs = jnp.where(jax.random.bernoulli(sign_key, 0.5, (N_SIGNS, n, F)),
                      1.0, -1.0).astype(jnp.float32)

    out = pl.pallas_call(
        process_model_action_kernel,
        out_shape=jax.ShapeDtypeStruct((n, F), jnp.float32),
        in_specs=[pl.BlockSpec(memory_space=pltpu.MemorySpace.VMEM)] * 5,
        out_specs=pl.BlockSpec(memory_space=pltpu.MemorySpace.VMEM),
    )(state_pad, action_pad, w_slab, b_slab, signs)

    return out[:, :dim_x].reshape(bs, k, dim_x)


process_model_action = jax.jit(_process_model_action)


if __name__ == "__main__":
    key = jax.random.PRNGKey(0)
    k_params, k_state, k_action, k_sign = jax.random.split(key, 4)

    w_slab, b_slab = init_packed_params(k_params)
    last_state = jax.random.normal(k_state, (BATCH, NUM_ENSEMBLE, DIM_X), jnp.float32)
    action = jax.random.normal(k_action, (BATCH, NUM_ENSEMBLE, DIM_A), jnp.float32)

    out = process_model_action(last_state, action, w_slab, b_slab, k_sign)
    jax.block_until_ready(out)

    assert out.shape == (BATCH, NUM_ENSEMBLE, DIM_X)
    assert bool(jnp.all(jnp.isfinite(out)))
    print("KERNEL_OK")
</pallas_src>

<mosaic_0001>
module attributes {stable_mosaic.version = 11 : i64} {
  func.func @process_model_action_kernel(%arg0: memref<16x128xf32, #tpu.memory_space<vmem>>, %arg1: memref<16x128xf32, #tpu.memory_space<vmem>>, %arg2: memref<18x128x128xf32, #tpu.memory_space<vmem>>, %arg3: memref<16x128xf32, #tpu.memory_space<vmem>>, %arg4: memref<17x16x128xf32, #tpu.memory_space<vmem>>, %arg5: memref<16x128xf32, #tpu.memory_space<vmem>>) attributes {dimension_semantics = [], scalar_prefetch = 0 : i64, scratch_operands = 0 : i64, tpu.core_type = #tpu.core_type<tc>} {
    %c0 = arith.constant 0 : index
    %c0_0 = arith.constant 0 : index
    %0 = vector.load %arg3[%c0, %c0_0] : memref<16x128xf32, #tpu.memory_space<vmem>>, vector<16x128xf32>
    %c0_1 = arith.constant 0 : index
    %c0_2 = arith.constant 0 : index
    %1 = vector.load %arg0[%c0_1, %c0_2] : memref<16x128xf32, #tpu.memory_space<vmem>>, vector<16x128xf32>
    %c0_3 = arith.constant 0 : index
    %c0_4 = arith.constant 0 : index
    %2 = vector.load %arg1[%c0_3, %c0_4] : memref<16x128xf32, #tpu.memory_space<vmem>>, vector<16x128xf32>
    %c0_5 = arith.constant 0 : index
    %c0_6 = arith.constant 0 : index
    %c0_7 = arith.constant 0 : index
    %3 = vector.load %arg2[%c0_5, %c0_6, %c0_7] : memref<18x128x128xf32, #tpu.memory_space<vmem>>, vector<1x128x128xf32>
    %4 = vector.shape_cast %3 : vector<1x128x128xf32> to vector<128x128xf32>
    %cst = arith.constant dense<0.000000e+00> : vector<16x128xf32>
    %5 = tpu.matmul %1, %4, %cst {dimension_numbers = #tpu.dot_dimension_numbers<[1], [0], [0], [1], [0, 0, 1, 1], [], []>} : vector<16x128xf32>, vector<128x128xf32>, vector<16x128xf32> -> vector<16x128xf32>
    %6 = vector.extract_strided_slice %0 {offsets = [0, 0], sizes = [1, 128], strides = [1, 1]} : vector<16x128xf32> to vector<1x128xf32>
    %7 = vector.broadcast %6 : vector<1x128xf32> to vector<16x128xf32>
    %8 = arith.addf %5, %7 : vector<16x128xf32>
    %c0_8 = arith.constant 0 : index
    %c0_9 = arith.constant 0 : index
    %c0_10 = arith.constant 0 : index
    %9 = vector.load %arg4[%c0_8, %c0_9, %c0_10] : memref<17x16x128xf32, #tpu.memory_space<vmem>>, vector<1x16x128xf32>
    %10 = vector.shape_cast %9 : vector<1x16x128xf32> to vector<16x128xf32>
    %11 = arith.mulf %1, %10 : vector<16x128xf32>
    %c1 = arith.constant 1 : index
    %c0_11 = arith.constant 0 : index
    %c0_12 = arith.constant 0 : index
    %12 = vector.load %arg2[%c1, %c0_11, %c0_12] : memref<18x128x128xf32, #tpu.memory_space<vmem>>, vector<1x128x128xf32>
    %13 = vector.shape_cast %12 : vector<1x128x128xf32> to vector<128x128xf32>
    %cst_13 = arith.constant dense<0.000000e+00> : vector<16x128xf32>
    %14 = tpu.matmul %11, %13, %cst_13 {dimension_numbers = #tpu.dot_dimension_numbers<[1], [0], [0], [1], [0, 0, 1, 1], [], []>} : vector<16x128xf32>, vector<128x128xf32>, vector<16x128xf32> -> vector<16x128xf32>
    %15 = vector.extract_strided_slice %0 {offsets = [8, 0], sizes = [1, 128], strides = [1, 1]} : vector<16x128xf32> to vector<1x128xf32>
    %16 = vector.broadcast %15 : vector<1x128xf32> to vector<16x128xf32>
    %17 = arith.addf %14, %16 : vector<16x128xf32>
    %c1_14 = arith.constant 1 : index
    %c0_15 = arith.constant 0 : index
    %c0_16 = arith.constant 0 : index
    %18 = vector.load %arg4[%c1_14, %c0_15, %c0_16] : memref<17x16x128xf32, #tpu.memory_space<vmem>>, vector<1x16x128xf32>
    %19 = vector.shape_cast %18 : vector<1x16x128xf32> to vector<16x128xf32>
    %20 = arith.mulf %17, %19 : vector<16x128xf32>
    %21 = arith.addf %8, %20 : vector<16x128xf32>
    %cst_17 = arith.constant 0.000000e+00 : f32
    %22 = vector.broadcast %cst_17 : f32 to vector<16x128xf32>
    %23 = arith.maximumf %21, %22 : vector<16x128xf32>
    %c2 = arith.constant 2 : index
    %c0_18 = arith.constant 0 : index
    %c0_19 = arith.constant 0 : index
    %24 = vector.load %arg2[%c2, %c0_18, %c0_19] : memref<18x128x128xf32, #tpu.memory_space<vmem>>, vector<1x128x128xf32>
    %25 = vector.shape_cast %24 : vector<1x128x128xf32> to vector<128x128xf32>
    %cst_20 = arith.constant dense<0.000000e+00> : vector<16x128xf32>
    %26 = tpu.matmul %23, %25, %cst_20 {dimension_numbers = #tpu.dot_dimension_numbers<[1], [0], [0], [1], [0, 0, 1, 1], [], []>} : vector<16x128xf32>, vector<128x128xf32>, vector<16x128xf32> -> vector<16x128xf32>
    %27 = vector.extract_strided_slice %0 {offsets = [1, 0], sizes = [1, 128], strides = [1, 1]} : vector<16x128xf32> to vector<1x128xf32>
    %28 = vector.broadcast %27 : vector<1x128xf32> to vector<16x128xf32>
    %29 = arith.addf %26, %28 : vector<16x128xf32>
    %c2_21 = arith.constant 2 : index
    %c0_22 = arith.constant 0 : index
    %c0_23 = arith.constant 0 : index
    %30 = vector.load %arg4[%c2_21, %c0_22, %c0_23] : memref<17x16x128xf32, #tpu.memory_space<vmem>>, vector<1x16x128xf32>
    %31 = vector.shape_cast %30 : vector<1x16x128xf32> to vector<16x128xf32>
    %32 = arith.mulf %23, %31 : vector<16x128xf32>
    %c3 = arith.constant 3 : index
    %c0_24 = arith.constant 0 : index
    %c0_25 = arith.constant 0 : index
    %33 = vector.load %arg2[%c3, %c0_24, %c0_25] : memref<18x128x128xf32, #tpu.memory_space<vmem>>, vector<1x128x128xf32>
    %34 = vector.shape_cast %33 : vector<1x128x128xf32> to vector<128x128xf32>
    %cst_26 = arith.constant dense<0.000000e+00> : vector<16x128xf32>
    %35 = tpu.matmul %32, %34, %cst_26 {dimension_numbers = #tpu.dot_dimension_numbers<[1], [0], [0], [1], [0, 0, 1, 1], [], []>} : vector<16x128xf32>, vector<128x128xf32>, vector<16x128xf32> -> vector<16x128xf32>
    %36 = vector.extract_strided_slice %0 {offsets = [9, 0], sizes = [1, 128], strides = [1, 1]} : vector<16x128xf32> to vector<1x128xf32>
    %37 = vector.broadcast %36 : vector<1x128xf32> to vector<16x128xf32>
    %38 = arith.addf %35, %37 : vector<16x128xf32>
    %c3_27 = arith.constant 3 : index
    %c0_28 = arith.constant 0 : index
    %c0_29 = arith.constant 0 : index
    %39 = vector.load %arg4[%c3_27, %c0_28, %c0_29] : memref<17x16x128xf32, #tpu.memory_space<vmem>>, vector<1x16x128xf32>
    %40 = vector.shape_cast %39 : vector<1x16x128xf32> to vector<16x128xf32>
    %41 = arith.mulf %38, %40 : vector<16x128xf32>
    %42 = arith.addf %29, %41 : vector<16x128xf32>
    %cst_30 = arith.constant 0.000000e+00 : f32
    %43 = vector.broadcast %cst_30 : f32 to vector<16x128xf32>
    %44 = arith.maximumf %42, %43 : vector<16x128xf32>
    %c4 = arith.constant 4 : index
    %c0_31 = arith.constant 0 : index
    %c0_32 = arith.constant 0 : index
    %45 = vector.load %arg2[%c4, %c0_31, %c0_32] : memref<18x128x128xf32, #tpu.memory_space<vmem>>, vector<1x128x128xf32>
    %46 = vector.shape_cast %45 : vector<1x128x128xf32> to vector<128x128xf32>
    %cst_33 = arith.constant dense<0.000000e+00> : vector<16x128xf32>
    %47 = tpu.matmul %44, %46, %cst_33 {dimension_numbers = #tpu.dot_dimension_numbers<[1], [0], [0], [1], [0, 0, 1, 1], [], []>} : vector<16x128xf32>, vector<128x128xf32>, vector<16x128xf32> -> vector<16x128xf32>
    %48 = vector.extract_strided_slice %0 {offsets = [2, 0], sizes = [1, 128], strides = [1, 1]} : vector<16x128xf32> to vector<1x128xf32>
    %49 = vector.broadcast %48 : vector<1x128xf32> to vector<16x128xf32>
    %50 = arith.addf %47, %49 : vector<16x128xf32>
    %c4_34 = arith.constant 4 : index
    %c0_35 = arith.constant 0 : index
    %c0_36 = arith.constant 0 : index
    %51 = vector.load %arg4[%c4_34, %c0_35, %c0_36] : memref<17x16x128xf32, #tpu.memory_space<vmem>>, vector<1x16x128xf32>
    %52 = vector.shape_cast %51 : vector<1x16x128xf32> to vector<16x128xf32>
    %53 = arith.mulf %44, %52 : vector<16x128xf32>
    %c5 = arith.constant 5 : index
    %c0_37 = arith.constant 0 : index
    %c0_38 = arith.constant 0 : index
    %54 = vector.load %arg2[%c5, %c0_37, %c0_38] : memref<18x128x128xf32, #tpu.memory_space<vmem>>, vector<1x128x128xf32>
    %55 = vector.shape_cast %54 : vector<1x128x128xf32> to vector<128x128xf32>
    %cst_39 = arith.constant dense<0.000000e+00> : vector<16x128xf32>
    %56 = tpu.matmul %53, %55, %cst_39 {dimension_numbers = #tpu.dot_dimension_numbers<[1], [0], [0], [1], [0, 0, 1, 1], [], []>} : vector<16x128xf32>, vector<128x128xf32>, vector<16x128xf32> -> vector<16x128xf32>
    %57 = vector.extract_strided_slice %0 {offsets = [10, 0], sizes = [1, 128], strides = [1, 1]} : vector<16x128xf32> to vector<1x128xf32>
    %58 = vector.broadcast %57 : vector<1x128xf32> to vector<16x128xf32>
    %59 = arith.addf %56, %58 : vector<16x128xf32>
    %c5_40 = arith.constant 5 : index
    %c0_41 = arith.constant 0 : index
    %c0_42 = arith.constant 0 : index
    %60 = vector.load %arg4[%c5_40, %c0_41, %c0_42] : memref<17x16x128xf32, #tpu.memory_space<vmem>>, vector<1x16x128xf32>
    %61 = vector.shape_cast %60 : vector<1x16x128xf32> to vector<16x128xf32>
    %62 = arith.mulf %59, %61 : vector<16x128xf32>
    %63 = arith.addf %50, %62 : vector<16x128xf32>
    %cst_43 = arith.constant 0.000000e+00 : f32
    %64 = vector.broadcast %cst_43 : f32 to vector<16x128xf32>
    %65 = arith.maximumf %63, %64 : vector<16x128xf32>
    %c6 = arith.constant 6 : index
    %c0_44 = arith.constant 0 : index
    %c0_45 = arith.constant 0 : index
    %66 = vector.load %arg2[%c6, %c0_44, %c0_45] : memref<18x128x128xf32, #tpu.memory_space<vmem>>, vector<1x128x128xf32>
    %67 = vector.shape_cast %66 : vector<1x128x128xf32> to vector<128x128xf32>
    %cst_46 = arith.constant dense<0.000000e+00> : vector<16x128xf32>
    %68 = tpu.matmul %2, %67, %cst_46 {dimension_numbers = #tpu.dot_dimension_numbers<[1], [0], [0], [1], [0, 0, 1, 1], [], []>} : vector<16x128xf32>, vector<128x128xf32>, vector<16x128xf32> -> vector<16x128xf32>
    %69 = vector.extract_strided_slice %0 {offsets = [3, 0], sizes = [1, 128], strides = [1, 1]} : vector<16x128xf32> to vector<1x128xf32>
    %70 = vector.broadcast %69 : vector<1x128xf32> to vector<16x128xf32>
    %71 = arith.addf %68, %70 : vector<16x128xf32>
    %c6_47 = arith.constant 6 : index
    %c0_48 = arith.constant 0 : index
    %c0_49 = arith.constant 0 : index
    %72 = vector.load %arg4[%c6_47, %c0_48, %c0_49] : memref<17x16x128xf32, #tpu.memory_space<vmem>>, vector<1x16x128xf32>
    %73 = vector.shape_cast %72 : vector<1x16x128xf32> to vector<16x128xf32>
    %74 = arith.mulf %2, %73 : vector<16x128xf32>
    %c7 = arith.constant 7 : index
    %c0_50 = arith.constant 0 : index
    %c0_51 = arith.constant 0 : index
    %75 = vector.load %arg2[%c7, %c0_50, %c0_51] : memref<18x128x128xf32, #tpu.memory_space<vmem>>, vector<1x128x128xf32>
    %76 = vector.shape_cast %75 : vector<1x128x128xf32> to vector<128x128xf32>
    %cst_52 = arith.constant dense<0.000000e+00> : vector<16x128xf32>
    %77 = tpu.matmul %74, %76, %cst_52 {dimension_numbers = #tpu.dot_dimension_numbers<[1], [0], [0], [1], [0, 0, 1, 1], [], []>} : vector<16x128xf32>, vector<128x128xf32>, vector<16x128xf32> -> vector<16x128xf32>
    %78 = vector.extract_strided_slice %0 {offsets = [11, 0], sizes = [1, 128], strides = [1, 1]} : vector<16x128xf32> to vector<1x128xf32>
    %79 = vector.broadcast %78 : vector<1x128xf32> to vector<16x128xf32>
    %80 = arith.addf %77, %79 : vector<16x128xf32>
    %c7_53 = arith.constant 7 : index
    %c0_54 = arith.constant 0 : index
    %c0_55 = arith.constant 0 : index
    %81 = vector.load %arg4[%c7_53, %c0_54, %c0_55] : memref<17x16x128xf32, #tpu.memory_space<vmem>>, vector<1x16x128xf32>
    %82 = vector.shape_cast %81 : vector<1x16x128xf32> to vector<16x128xf32>
    %83 = arith.mulf %80, %82 : vector<16x128xf32>
    %84 = arith.addf %71, %83 : vector<16x128xf32>
    %cst_56 = arith.constant 0.000000e+00 : f32
    %85 = vector.broadcast %cst_56 : f32 to vector<16x128xf32>
    %86 = arith.maximumf %84, %85 : vector<16x128xf32>
    %c8 = arith.constant 8 : index
    %c0_57 = arith.constant 0 : index
    %c0_58 = arith.constant 0 : index
    %87 = vector.load %arg2[%c8, %c0_57, %c0_58] : memref<18x128x128xf32, #tpu.memory_space<vmem>>, vector<1x128x128xf32>
    %88 = vector.shape_cast %87 : vector<1x128x128xf32> to vector<128x128xf32>
    %cst_59 = arith.constant dense<0.000000e+00> : vector<16x128xf32>
    %89 = tpu.matmul %86, %88, %cst_59 {dimension_numbers = #tpu.dot_dimension_numbers<[1], [0], [0], [1], [0, 0, 1, 1], [], []>} : vector<16x128xf32>, vector<128x128xf32>, vector<16x128xf32> -> vector<16x128xf32>
    %90 = vector.extract_strided_slice %0 {offsets = [4, 0], sizes = [1, 128], strides = [1, 1]} : vector<16x128xf32> to vector<1x128xf32>
    %91 = vector.broadcast %90 : vector<1x128xf32> to vector<16x128xf32>
    %92 = arith.addf %89, %91 : vector<16x128xf32>
    %c8_60 = arith.constant 8 : index
    %c0_61 = arith.constant 0 : index
    %c0_62 = arith.constant 0 : index
    %93 = vector.load %arg4[%c8_60, %c0_61, %c0_62] : memref<17x16x128xf32, #tpu.memory_space<vmem>>, vector<1x16x128xf32>
    %94 = vector.shape_cast %93 : vector<1x16x128xf32> to vector<16x128xf32>
    %95 = arith.mulf %86, %94 : vector<16x128xf32>
    %c9 = arith.constant 9 : index
    %c0_63 = arith.constant 0 : index
    %c0_64 = arith.constant 0 : index
    %96 = vector.load %arg2[%c9, %c0_63, %c0_64] : memref<18x128x128xf32, #tpu.memory_space<vmem>>, vector<1x128x128xf32>
    %97 = vector.shape_cast %96 : vector<1x128x128xf32> to vector<128x128xf32>
    %cst_65 = arith.constant dense<0.000000e+00> : vector<16x128xf32>
    %98 = tpu.matmul %95, %97, %cst_65 {dimension_numbers = #tpu.dot_dimension_numbers<[1], [0], [0], [1], [0, 0, 1, 1], [], []>} : vector<16x128xf32>, vector<128x128xf32>, vector<16x128xf32> -> vector<16x128xf32>
    %99 = vector.extract_strided_slice %0 {offsets = [12, 0], sizes = [1, 128], strides = [1, 1]} : vector<16x128xf32> to vector<1x128xf32>
    %100 = vector.broadcast %99 : vector<1x128xf32> to vector<16x128xf32>
    %101 = arith.addf %98, %100 : vector<16x128xf32>
    %c9_66 = arith.constant 9 : index
    %c0_67 = arith.constant 0 : index
    %c0_68 = arith.constant 0 : index
    %102 = vector.load %arg4[%c9_66, %c0_67, %c0_68] : memref<17x16x128xf32, #tpu.memory_space<vmem>>, vector<1x16x128xf32>
    %103 = vector.shape_cast %102 : vector<1x16x128xf32> to vector<16x128xf32>
    %104 = arith.mulf %101, %103 : vector<16x128xf32>
    %105 = arith.addf %92, %104 : vector<16x128xf32>
    %cst_69 = arith.constant 0.000000e+00 : f32
    %106 = vector.broadcast %cst_69 : f32 to vector<16x128xf32>
    %107 = arith.maximumf %105, %106 : vector<16x128xf32>
    %c10 = arith.constant 10 : index
    %c0_70 = arith.constant 0 : index
    %c0_71 = arith.constant 0 : index
    %108 = vector.load %arg2[%c10, %c0_70, %c0_71] : memref<18x128x128xf32, #tpu.memory_space<vmem>>, vector<1x128x128xf32>
    %109 = vector.shape_cast %108 : vector<1x128x128xf32> to vector<128x128xf32>
    %cst_72 = arith.constant dense<0.000000e+00> : vector<16x128xf32>
    %110 = tpu.matmul %107, %109, %cst_72 {dimension_numbers = #tpu.dot_dimension_numbers<[1], [0], [0], [1], [0, 0, 1, 1], [], []>} : vector<16x128xf32>, vector<128x128xf32>, vector<16x128xf32> -> vector<16x128xf32>
    %111 = vector.extract_strided_slice %0 {offsets = [5, 0], sizes = [1, 128], strides = [1, 1]} : vector<16x128xf32> to vector<1x128xf32>
    %112 = vector.broadcast %111 : vector<1x128xf32> to vector<16x128xf32>
    %113 = arith.addf %110, %112 : vector<16x128xf32>
    %c10_73 = arith.constant 10 : index
    %c0_74 = arith.constant 0 : index
    %c0_75 = arith.constant 0 : index
    %114 = vector.load %arg4[%c10_73, %c0_74, %c0_75] : memref<17x16x128xf32, #tpu.memory_space<vmem>>, vector<1x16x128xf32>
    %115 = vector.shape_cast %114 : vector<1x16x128xf32> to vector<16x128xf32>
    %116 = arith.mulf %107, %115 : vector<16x128xf32>
    %c11 = arith.constant 11 : index
    %c0_76 = arith.constant 0 : index
    %c0_77 = arith.constant 0 : index
    %117 = vector.load %arg2[%c11, %c0_76, %c0_77] : memref<18x128x128xf32, #tpu.memory_space<vmem>>, vector<1x128x128xf32>
    %118 = vector.shape_cast %117 : vector<1x128x128xf32> to vector<128x128xf32>
    %cst_78 = arith.constant dense<0.000000e+00> : vector<16x128xf32>
    %119 = tpu.matmul %116, %118, %cst_78 {dimension_numbers = #tpu.dot_dimension_numbers<[1], [0], [0], [1], [0, 0, 1, 1], [], []>} : vector<16x128xf32>, vector<128x128xf32>, vector<16x128xf32> -> vector<16x128xf32>
    %120 = vector.extract_strided_slice %0 {offsets = [13, 0], sizes = [1, 128], strides = [1, 1]} : vector<16x128xf32> to vector<1x128xf32>
    %121 = vector.broadcast %120 : vector<1x128xf32> to vector<16x128xf32>
    %122 = arith.addf %119, %121 : vector<16x128xf32>
    %c11_79 = arith.constant 11 : index
    %c0_80 = arith.constant 0 : index
    %c0_81 = arith.constant 0 : index
    %123 = vector.load %arg4[%c11_79, %c0_80, %c0_81] : memref<17x16x128xf32, #tpu.memory_space<vmem>>, vector<1x16x128xf32>
    %124 = vector.shape_cast %123 : vector<1x16x128xf32> to vector<16x128xf32>
    %125 = arith.mulf %122, %124 : vector<16x128xf32>
    %126 = arith.addf %113, %125 : vector<16x128xf32>
    %cst_82 = arith.constant 0.000000e+00 : f32
    %127 = vector.broadcast %cst_82 : f32 to vector<16x128xf32>
    %128 = arith.maximumf %126, %127 : vector<16x128xf32>
    %c12 = arith.constant 12 : index
    %c0_83 = arith.constant 0 : index
    %c0_84 = arith.constant 0 : index
    %129 = vector.load %arg2[%c12, %c0_83, %c0_84] : memref<18x128x128xf32, #tpu.memory_space<vmem>>, vector<1x128x128xf32>
    %130 = vector.shape_cast %129 : vector<1x128x128xf32> to vector<128x128xf32>
    %cst_85 = arith.constant dense<0.000000e+00> : vector<16x128xf32>
    %131 = tpu.matmul %65, %130, %cst_85 {dimension_numbers = #tpu.dot_dimension_numbers<[1], [0], [0], [1], [0, 0, 1, 1], [], []>} : vector<16x128xf32>, vector<128x128xf32>, vector<16x128xf32> -> vector<16x128xf32>
    %c13 = arith.constant 13 : index
    %c0_86 = arith.constant 0 : index
    %c0_87 = arith.constant 0 : index
    %132 = vector.load %arg2[%c13, %c0_86, %c0_87] : memref<18x128x128xf32, #tpu.memory_space<vmem>>, vector<1x128x128xf32>
    %133 = vector.shape_cast %132 : vector<1x128x128xf32> to vector<128x128xf32>
    %cst_88 = arith.constant dense<0.000000e+00> : vector<16x128xf32>
    %134 = tpu.matmul %128, %133, %cst_88 {dimension_numbers = #tpu.dot_dimension_numbers<[1], [0], [0], [1], [0, 0, 1, 1], [], []>} : vector<16x128xf32>, vector<128x128xf32>, vector<16x128xf32> -> vector<16x128xf32>
    %135 = arith.addf %131, %134 : vector<16x128xf32>
    %136 = vector.extract_strided_slice %0 {offsets = [6, 0], sizes = [1, 128], strides = [1, 1]} : vector<16x128xf32> to vector<1x128xf32>
    %137 = vector.broadcast %136 : vector<1x128xf32> to vector<16x128xf32>
    %138 = arith.addf %135, %137 : vector<16x128xf32>
    %c12_89 = arith.constant 12 : index
    %c0_90 = arith.constant 0 : index
    %c0_91 = arith.constant 0 : index
    %139 = vector.load %arg4[%c12_89, %c0_90, %c0_91] : memref<17x16x128xf32, #tpu.memory_space<vmem>>, vector<1x16x128xf32>
    %140 = vector.shape_cast %139 : vector<1x16x128xf32> to vector<16x128xf32>
    %141 = arith.mulf %65, %140 : vector<16x128xf32>
    %c14 = arith.constant 14 : index
    %c0_92 = arith.constant 0 : index
    %c0_93 = arith.constant 0 : index
    %142 = vector.load %arg2[%c14, %c0_92, %c0_93] : memref<18x128x128xf32, #tpu.memory_space<vmem>>, vector<1x128x128xf32>
    %143 = vector.shape_cast %142 : vector<1x128x128xf32> to vector<128x128xf32>
    %cst_94 = arith.constant dense<0.000000e+00> : vector<16x128xf32>
    %144 = tpu.matmul %141, %143, %cst_94 {dimension_numbers = #tpu.dot_dimension_numbers<[1], [0], [0], [1], [0, 0, 1, 1], [], []>} : vector<16x128xf32>, vector<128x128xf32>, vector<16x128xf32> -> vector<16x128xf32>
    %c13_95 = arith.constant 13 : index
    %c0_96 = arith.constant 0 : index
    %c0_97 = arith.constant 0 : index
    %145 = vector.load %arg4[%c13_95, %c0_96, %c0_97] : memref<17x16x128xf32, #tpu.memory_space<vmem>>, vector<1x16x128xf32>
    %146 = vector.shape_cast %145 : vector<1x16x128xf32> to vector<16x128xf32>
    %147 = arith.mulf %128, %146 : vector<16x128xf32>
    %c15 = arith.constant 15 : index
    %c0_98 = arith.constant 0 : index
    %c0_99 = arith.constant 0 : index
    %148 = vector.load %arg2[%c15, %c0_98, %c0_99] : memref<18x128x128xf32, #tpu.memory_space<vmem>>, vector<1x128x128xf32>
    %149 = vector.shape_cast %148 : vector<1x128x128xf32> to vector<128x128xf32>
    %cst_100 = arith.constant dense<0.000000e+00> : vector<16x128xf32>
    %150 = tpu.matmul %147, %149, %cst_100 {dimension_numbers = #tpu.dot_dimension_numbers<[1], [0], [0], [1], [0, 0, 1, 1], [], []>} : vector<16x128xf32>, vector<128x128xf32>, vector<16x128xf32> -> vector<16x128xf32>
    %151 = arith.addf %144, %150 : vector<16x128xf32>
    %152 = vector.extract_strided_slice %0 {offsets = [14, 0], sizes = [1, 128], strides = [1, 1]} : vector<16x128xf32> to vector<1x128xf32>
    %153 = vector.broadcast %152 : vector<1x128xf32> to vector<16x128xf32>
    %154 = arith.addf %151, %153 : vector<16x128xf32>
    %c14_101 = arith.constant 14 : index
    %c0_102 = arith.constant 0 : index
    %c0_103 = arith.constant 0 : index
    %155 = vector.load %arg4[%c14_101, %c0_102, %c0_103] : memref<17x16x128xf32, #tpu.memory_space<vmem>>, vector<1x16x128xf32>
    %156 = vector.shape_cast %155 : vector<1x16x128xf32> to vector<16x128xf32>
    %157 = arith.mulf %154, %156 : vector<16x128xf32>
    %158 = arith.addf %138, %157 : vector<16x128xf32>
    %c16 = arith.constant 16 : index
    %c0_104 = arith.constant 0 : index
    %c0_105 = arith.constant 0 : index
    %159 = vector.load %arg2[%c16, %c0_104, %c0_105] : memref<18x128x128xf32, #tpu.memory_space<vmem>>, vector<1x128x128xf32>
    %160 = vector.shape_cast %159 : vector<1x128x128xf32> to vector<128x128xf32>
    %cst_106 = arith.constant dense<0.000000e+00> : vector<16x128xf32>
    %161 = tpu.matmul %158, %160, %cst_106 {dimension_numbers = #tpu.dot_dimension_numbers<[1], [0], [0], [1], [0, 0, 1, 1], [], []>} : vector<16x128xf32>, vector<128x128xf32>, vector<16x128xf32> -> vector<16x128xf32>
    %162 = vector.extract_strided_slice %0 {offsets = [7, 0], sizes = [1, 128], strides = [1, 1]} : vector<16x128xf32> to vector<1x128xf32>
    %163 = vector.broadcast %162 : vector<1x128xf32> to vector<16x128xf32>
    %164 = arith.addf %161, %163 : vector<16x128xf32>
    %c15_107 = arith.constant 15 : index
    %c0_108 = arith.constant 0 : index
    %c0_109 = arith.constant 0 : index
    %165 = vector.load %arg4[%c15_107, %c0_108, %c0_109] : memref<17x16x128xf32, #tpu.memory_space<vmem>>, vector<1x16x128xf32>
    %166 = vector.shape_cast %165 : vector<1x16x128xf32> to vector<16x128xf32>
    %167 = arith.mulf %158, %166 : vector<16x128xf32>
    %c17 = arith.constant 17 : index
    %c0_110 = arith.constant 0 : index
    %c0_111 = arith.constant 0 : index
    %168 = vector.load %arg2[%c17, %c0_110, %c0_111] : memref<18x128x128xf32, #tpu.memory_space<vmem>>, vector<1x128x128xf32>
    %169 = vector.shape_cast %168 : vector<1x128x128xf32> to vector<128x128xf32>
    %cst_112 = arith.constant dense<0.000000e+00> : vector<16x128xf32>
    %170 = tpu.matmul %167, %169, %cst_112 {dimension_numbers = #tpu.dot_dimension_numbers<[1], [0], [0], [1], [0, 0, 1, 1], [], []>} : vector<16x128xf32>, vector<128x128xf32>, vector<16x128xf32> -> vector<16x128xf32>
    %171 = vector.extract_strided_slice %0 {offsets = [15, 0], sizes = [1, 128], strides = [1, 1]} : vector<16x128xf32> to vector<1x128xf32>
    %172 = vector.broadcast %171 : vector<1x128xf32> to vector<16x128xf32>
    %173 = arith.addf %170, %172 : vector<16x128xf32>
    %c16_113 = arith.constant 16 : index
    %c0_114 = arith.constant 0 : index
    %c0_115 = arith.constant 0 : index
    %174 = vector.load %arg4[%c16_113, %c0_114, %c0_115] : memref<17x16x128xf32, #tpu.memory_space<vmem>>, vector<1x16x128xf32>
    %175 = vector.shape_cast %174 : vector<1x16x128xf32> to vector<16x128xf32>
    %176 = arith.mulf %173, %175 : vector<16x128xf32>
    %177 = arith.addf %164, %176 : vector<16x128xf32>
    %178 = arith.addf %1, %177 : vector<16x128xf32>
    %c0_116 = arith.constant 0 : index
    %c0_117 = arith.constant 0 : index
    %179 = vector.load %arg5[%c0_116, %c0_117] : memref<16x128xf32, #tpu.memory_space<vmem>>, vector<16x128xf32>
    tpu.vector_store %arg5[%c0_116, %c0_117], %178 {strides = array<i32>} : memref<16x128xf32, #tpu.memory_space<vmem>>, vector<16x128xf32>,
    return
  }
}

</mosaic_0001>

<bundles_post_ra>
// kernel: _process_model_action.1
= control target key start
LH: loop header
LB: loop body
LE: loop exit
PB: predicated region body
PF: predicated region fallthrough
CT: control target
= control target key end

     0   :  { %10 = vsyncpa [#allocation3], 0  ;;  %s3745_s0 = inlined_call_operand.vmem [shape: f32[16,128], index: 0, kind: input, shape index: {}]   ;;  %s3746_s1 = inlined_call_operand.vmem [shape: f32[16,128], index: 1, kind: input, shape index: {}]   ;;  %s3747_s2 = inlined_call_operand.hbm [shape: f32[18,128,128], index: 2, kind: input, shape index: {}]   ;;  %s3748_s3 = inlined_call_operand.hbm [shape: f32[16,128], index: 3, kind: input, shape index: {}]   ;;  %s3749_s4 = inlined_call_operand.vmem [shape: f32[17,16,128], index: 4, kind: input, shape index: {}]   ;;  %s3750_s5 = inlined_call_operand.vmem [shape: f32[16,128], index: 5, kind: output, shape index: {}]  }
   0x1   :  { %11 = vsyncpa [#allocation5], 0  ;;  %s3521_s18 = smov [#allocation2]   ;;  %s3473_s22 = scalar_lea.hbm %s3747_s2, 36864 }
   0x2   :  { %s21_s19 = sshll.u32 %s3521_s18, 4  ;;  %p3474_p0 = scmp.ne.s32.totalorder %s3747_s2, %s3473_s22  ;;  %s22_s19 = int_to_ptr.vmem [resolvable:$true] %s21_s19 }
   0x3   :  { %p3477_p1 = scmp.lt.u32.totalorder %s3473_s22, %s3747_s2 }
   0x5   :  { %p3479_p2 = pnand %p3477_p1, %p3474_p0 }
   0x7   :  { %3482 = shalt.err (!%p3479_p2)
}
   0x8   :  { %s3483_s27 = scalar_lea.vmem %s22_s19, 36864  ;;  %p3488_p4 = scmp.lt.s32.totalorder %s22_s19, %s22_s19 }
   0x9   :  { %p3484_p3 = scmp.ne.s32.totalorder %s22_s19, %s3483_s27  ;;  %p3489_p5 = scmp.lt.s32.totalorder %s3483_s27, %s3483_s27 }
   0xb   :  { %p3490_p6 = por %p3489_p5, %p3488_p4 }
   0xd   :  { %p3491_p7 = pnand %p3490_p6, %p3484_p3 }
   0xf   :  { %3494 = shalt.err (!%p3491_p7)
}
  0x10   :  { %s3522_s28 = smov 128   ;;  %s3523_s29 = smov 8  }
  0x11   :  { %27 = dma.hbm_to_vmem [thread:$0]  %s3747_s2, 36864, %s22_s19, [#allocation3], %s3522_s28, %s3522_s28, %s3523_s29  }
  0x12   :  { %s3524_s7 = smov [#allocation4]   ;;  %s3495_s11 = scalar_lea.hbm %s3748_s3, 256 }
  0x13   :  { %s33_s8 = sshll.u32 %s3524_s7, 4  ;;  %p3496_p8 = scmp.ne.s32.totalorder %s3748_s3, %s3495_s11  ;;  %s34_s8 = int_to_ptr.vmem [resolvable:$true] %s33_s8 }
  0x14   :  { %p3499_p9 = scmp.lt.u32.totalorder %s3495_s11, %s3748_s3 }
  0x16   :  { %p3501_p10 = pnand %p3499_p9, %p3496_p8 }
  0x18   :  { %3504 = shalt.err (!%p3501_p10)
}
  0x19   :  { %s3505_s16 = scalar_lea.vmem %s34_s8, 256  ;;  %p3510_p12 = scmp.lt.s32.totalorder %s34_s8, %s34_s8 }
  0x1a   :  { %p3506_p11 = scmp.ne.s32.totalorder %s34_s8, %s3505_s16  ;;  %p3511_p13 = scmp.lt.s32.totalorder %s3505_s16, %s3505_s16 }
  0x1c   :  { %p3512_p0 = por %p3511_p13, %p3510_p12 }
  0x1e   :  { %p3513_p1 = pnand %p3512_p0, %p3506_p11 }
  0x20   :  { %3516 = shalt.err (!%p3513_p1)
}
  0x21   :  { %39 = dma.hbm_to_vmem [thread:$0]  %s3748_s3, 256, %s34_s8, [#allocation5], %s3522_s28, %s3522_s28, %s3523_s29  }
  0x22   :  { %3517 = dma.done.wait [#allocation3], 36864  }
  0x23   :  { %3518 = vsyncadd [#allocation3], 4294930432 }
  0x24   :  { %3519 = dma.done.wait [#allocation5], 256  }
  0x25   :  { %3520 = vsyncadd [#allocation5], 4294967040  ;;  %v154_v0 = vld [vmem:[#allocation2 + $0x80] sm:$0xff]  ;;  %v155_v1 = vld [vmem:[#allocation2 + $0x88] sm:$0xff] }
  0x26   :  { %v54_v2 = vld [vmem:[#allocation2] sm:$0xff]  ;;  %v2917_v3 = vpack.c.bf16 %v155_v1, %v154_v0  ;;  %v55_v4 = vld [vmem:[#allocation2 + $0x8] sm:$0xff]  ;;  %v156_v5 = vld [vmem:[#allocation2 + $0x90] sm:$0xff] }
  0x27   :  { %v157_v6 = vld [vmem:[#allocation2 + $0x98] sm:$0xff]  ;;  %v2885_v7 = vpack.c.bf16 %v55_v4, %v54_v2  ;;  %v56_v9 = vld [vmem:[#allocation2 + $0x10] sm:$0xff]  ;;  %v158_v11 = vld [vmem:[#allocation2 + $0xa0] sm:$0xff] }
  0x28   :  { %v2921_v8 = vpack.c.bf16 %v157_v6, %v156_v5  ;;  %v57_v10 = vld [vmem:[#allocation2 + $0x18] sm:$0xff]  ;;  %2918 = vmatprep.subr.bf16.mxu1 %v2917_v3  ;;  %v159_v13 = vld [vmem:[#allocation2 + $0xa8] sm:$0xff]  ;;  %v58_v14 = vld [vmem:[#allocation2 + $0x20] sm:$0xff] }
  0x29   :  { %v2889_v12 = vpack.c.bf16 %v57_v10, %v56_v9  ;;  %v59_v15 = vld [vmem:[#allocation2 + $0x28] sm:$0xff]  ;;  %2886 = vmatprep.subr.bf16.mxu0 %v2885_v7  ;;  %2920 = vmatpush3.bf16.msra.mxu1 %v2917_v3  ;;  %v2925_v16 = vpack.c.bf16 %v159_v13, %v158_v11  ;;  %v160_v18 = vld [vmem:[#allocation2 + $0xb0] sm:$0xff]  ;;  %v161_v19 = vld [vmem:[#allocation2 + $0xb8] sm:$0xff] }
  0x2a   :  { %2888 = vmatpush3.bf16.msra.mxu0 %v2885_v7  ;;  %2922 = vmatprep.subr.bf16.mxu1 %v2921_v8  ;;  %v2893_v17 = vpack.c.bf16 %v59_v15, %v58_v14  ;;  %v60_v20 = vld [vmem:[#allocation2 + $0x30] sm:$0xff]  ;;  %v61_v21 = vld [vmem:[#allocation2 + $0x38] sm:$0xff]  ;;  %v2929_v22 = vpack.c.bf16 %v161_v19, %v160_v18  ;;  %v162_v24 = vld [vmem:[#allocation2 + $0xc0] sm:$0xff] }
  0x2b   :  { %2890 = vmatprep.subr.bf16.mxu0 %v2889_v12  ;;  %v2897_v23 = vpack.c.bf16 %v61_v21, %v60_v20  ;;  %v163_v25 = vld [vmem:[#allocation2 + $0xc8] sm:$0xff]  ;;  %v50_v26 = vld [vmem:[%s3745_s0] sm:$0xff]  ;;  %v164_v33 = vld [vmem:[#allocation2 + $0xd0] sm:$0xff] }
  0x2c   :  { %v62_v27 = vld [vmem:[#allocation2 + $0x40] sm:$0xff]  ;;  %v63_v28 = vld [vmem:[#allocation2 + $0x48] sm:$0xff]  ;;  %2287 = vmatprep.mubr.f32.mxu0 %v50_v26  ;;  %v2933_v31 = vpack.c.bf16 %v163_v25, %v162_v24  ;;  %v165_v34 = vld [vmem:[#allocation2 + $0xd8] sm:$0xff] }
  0x2d   :  { %2924 = vmatpush3.bf16.msra.mxu1 %v2921_v8  ;;  %v149_v29 = vld [vmem:[%s3749_s4] sm:$0xff]  ;;  %v2901_v32 = vpack.c.bf16 %v63_v28, %v62_v27  ;;  %v64_v35 = vld [vmem:[#allocation2 + $0x50] sm:$0xff]  ;;  %v65_v36 = vld [vmem:[#allocation2 + $0x58] sm:$0xff]  ;;  %v2937_v37 = vpack.c.bf16 %v165_v34, %v164_v33 }
  0x2e   :  { %2892 = vmatpush3.bf16.msra.mxu0 %v2889_v12  ;;  %2926 = vmatprep.subr.bf16.mxu1 %v2925_v16  ;;  %v151_v30 = vmul.f32 %v149_v29, %v50_v26  ;;  %v2905_v38 = vpack.c.bf16 %v65_v36, %v64_v35  ;;  %v166_v39 = vld [vmem:[#allocation2 + $0xe0] sm:$0xff]  ;;  %v167_v40 = vld [vmem:[#allocation2 + $0xe8] sm:$0xff]  ;;  %v168_v45 = vld [vmem:[#allocation2 + $0xf0] sm:$0xff] }
  0x2f   :  { %2894 = vmatprep.subr.bf16.mxu0 %v2893_v17  ;;  %v66_v41 = vld [vmem:[#allocation2 + $0x60] sm:$0xff]  ;;  %v67_v42 = vld [vmem:[#allocation2 + $0x68] sm:$0xff]  ;;  %v2941_v43 = vpack.c.bf16 %v167_v40, %v166_v39  ;;  %v169_v46 = vld [vmem:[#allocation2 + $0xf8] sm:$0xff] }
  0x30   :  { %2322 = vmatprep.mubr.f32.mxu1 %v151_v30  ;;  %v2909_v44 = vpack.c.bf16 %v67_v42, %v66_v41  ;;  %v68_v47 = vld [vmem:[#allocation2 + $0x70] sm:$0xff]  ;;  %v69_v48 = vld [vmem:[#allocation2 + $0x78] sm:$0xff]  ;;  %v2945_v49 = vpack.c.bf16 %v169_v46, %v168_v45  ;;  %v360_v51 = vld [vmem:[#allocation2 + $0x180] sm:$0xff] }
  0x31   :  { %2928 = vmatpush3.bf16.msra.mxu1 %v2925_v16  ;;  %v2913_v50 = vpack.c.bf16 %v69_v48, %v68_v47  ;;  %v361_v52 = vld [vmem:[#allocation2 + $0x188] sm:$0xff]  ;;  %v259_v53 = vld [vmem:[#allocation2 + $0x100] sm:$0xff]  ;;  %v362_v59 = vld [vmem:[#allocation2 + $0x190] sm:$0xff] }
  0x32   :  { %2896 = vmatpush3.bf16.msra.mxu0 %v2893_v17  ;;  %2930 = vmatprep.subr.bf16.mxu1 %v2929_v22  ;;  %v260_v54 = vld [vmem:[#allocation2 + $0x108] sm:$0xff]  ;;  %v2981_v57 = vpack.c.bf16 %v361_v52, %v360_v51  ;;  %v363_v60 = vld [vmem:[#allocation2 + $0x198] sm:$0xff]  ;;  %v261_v62 = vld [vmem:[#allocation2 + $0x110] sm:$0xff] }
  0x33   :  { %2898 = vmatprep.subr.bf16.mxu0 %v2897_v23  ;;  %v51_v55 = vld [vmem:[%s3745_s0 + $0x8] sm:$0xff]  ;;  %v2949_v58 = vpack.c.bf16 %v260_v54, %v259_v53  ;;  %v262_v63 = vld [vmem:[#allocation2 + $0x118] sm:$0xff]  ;;  %v2985_v0 = vpack.c.bf16 %v363_v60, %v362_v59  ;;  %v364_v2 = vld [vmem:[#allocation2 + $0x1a0] sm:$0xff] }
  0x34   :  { %v150_v56 = vld [vmem:[%s3749_s4 + $0x8] sm:$0xff]  ;;  %v2953_v1 = vpack.c.bf16 %v262_v63, %v261_v62  ;;  %v263_v4 = vld [vmem:[#allocation2 + $0x120] sm:$0xff]  ;;  %v366_v8 = vld [vmem:[#allocation2 + $0x1b0] sm:$0xff] }
  0x35   :  { %2932 = vmatpush3.bf16.msra.mxu1 %v2929_v22  ;;  %v152_v61 = vmul.f32 %v150_v56, %v51_v55  ;;  %v365_v3 = vld [vmem:[#allocation2 + $0x1a8] sm:$0xff]  ;;  %v367_v9 = vld [vmem:[#allocation2 + $0x1b8] sm:$0xff]  ;;  %v265_v10 = vld [vmem:[#allocation2 + $0x130] sm:$0xff] }
  0x36   :  { %2900 = vmatpush3.bf16.msra.mxu0 %v2897_v23  ;;  %2934 = vmatprep.subr.bf16.mxu1 %v2933_v31  ;;  %v264_v5 = vld [vmem:[#allocation2 + $0x128] sm:$0xff]  ;;  %v2989_v6 = vpack.c.bf16 %v365_v3, %v364_v2  ;;  %v266_v11 = vld [vmem:[#allocation2 + $0x138] sm:$0xff]  ;;  %v2993_v12 = vpack.c.bf16 %v367_v9, %v366_v8  ;;  %v368_v14 = vld [vmem:[#allocation2 + $0x1c0] sm:$0xff] }
  0x37   :  { %2902 = vmatprep.subr.bf16.mxu0 %v2901_v32  ;;  %v2957_v7 = vpack.c.bf16 %v264_v5, %v263_v4  ;;  %v2961_v13 = vpack.c.bf16 %v266_v11, %v265_v10  ;;  %v369_v15 = vld [vmem:[#allocation2 + $0x1c8] sm:$0xff]  ;;  %v267_v16 = vld [vmem:[#allocation2 + $0x140] sm:$0xff]  ;;  %v269_v20 = vld [vmem:[#allocation2 + $0x150] sm:$0xff] }
  0x38   :  { %v268_v17 = vld [vmem:[#allocation2 + $0x148] sm:$0xff]  ;;  %v2997_v18 = vpack.c.bf16 %v369_v15, %v368_v14  ;;  %v270_v21 = vld [vmem:[#allocation2 + $0x158] sm:$0xff]  ;;  %v370_v23 = vld [vmem:[#allocation2 + $0x1d0] sm:$0xff] }
  0x39   :  { %2936 = vmatpush3.bf16.msra.mxu1 %v2933_v31  ;;  %v2965_v19 = vpack.c.bf16 %v268_v17, %v267_v16  ;;  %v2969_v22 = vpack.c.bf16 %v270_v21, %v269_v20  ;;  %v371_v24 = vld [vmem:[#allocation2 + $0x1d8] sm:$0xff]  ;;  %v271_v26 = vld [vmem:[#allocation2 + $0x160] sm:$0xff]  ;;  %v272_v27 = vld [vmem:[#allocation2 + $0x168] sm:$0xff] }
  0x3a   :  { %2904 = vmatpush3.bf16.msra.mxu0 %v2901_v32  ;;  %2938 = vmatprep.subr.bf16.mxu1 %v2937_v37  ;;  %v3001_v25 = vpack.c.bf16 %v371_v24, %v370_v23  ;;  %v2973_v28 = vpack.c.bf16 %v272_v27, %v271_v26  ;;  %v372_v29 = vld [vmem:[#allocation2 + $0x1e0] sm:$0xff]  ;;  %v373_v30 = vld [vmem:[#allocation2 + $0x1e8] sm:$0xff]  ;;  %v273_v32 = vld [vmem:[#allocation2 + $0x170] sm:$0xff] }
  0x3b   :  { %2906 = vmatprep.subr.bf16.mxu0 %v2905_v38  ;;  %v3005_v31 = vpack.c.bf16 %v373_v30, %v372_v29  ;;  %v274_v33 = vld [vmem:[#allocation2 + $0x178] sm:$0xff]  ;;  %v374_v35 = vld [vmem:[#allocation2 + $0x1f0] sm:$0xff]  ;;  %v466_v39 = vld [vmem:[#allocation2 + $0x208] sm:$0xff] }
  0x3c   :  { %v2977_v34 = vpack.c.bf16 %v274_v33, %v273_v32  ;;  %v375_v36 = vld [vmem:[#allocation2 + $0x1f8] sm:$0xff]  ;;  %v566_v40 = vld [vmem:[#allocation2 + $0x280] sm:$0xff]  ;;  %v567_v42 = vld [vmem:[#allocation2 + $0x288] sm:$0xff] }
  0x3d   :  { %2940 = vmatpush3.bf16.msra.mxu1 %v2937_v37  ;;  %v3009_v37 = vpack.c.bf16 %v375_v36, %v374_v35  ;;  %v3594_v47 = vld [vmem:[#allocation4 + $0x8] sm:$0xff]  ;;  %v3596_v48 = vld [vmem:[#allocation4] sm:$0xff]  ;;  %v1900_v52 = vld [vmem:[%s3749_s4 + $0x18] sm:$0xff] }
  0x3e   :  { %2908 = vmatpush3.bf16.msra.mxu0 %v2905_v38  ;;  %2942 = vmatprep.subr.bf16.mxu1 %v2941_v43  ;;  %v465_v38 = vld [vmem:[#allocation2 + $0x200] sm:$0xff]  ;;  %v1899_v56 = vld [vmem:[%s3749_s4 + $0x10] sm:$0xff]  ;;  %v468_v2 = vld [vmem:[#allocation2 + $0x218] sm:$0xff] }
  0x3f   :  { %2910 = vmatprep.subr.bf16.mxu0 %v2909_v44  ;;  %v3013_v41 = vpack.c.bf16 %v466_v39, %v465_v38  ;;  %v1901_v4 = vld [vmem:[%s3749_s4 + $0x20] sm:$0xff]  ;;  %v1902_v5 = vld [vmem:[%s3749_s4 + $0x28] sm:$0xff]  ;;  %v569_v8 = vld [vmem:[#allocation2 + $0x298] sm:$0xff] }
  0x40   :  { %v469_v11 = vld [vmem:[#allocation2 + $0x220] sm:$0xff]  ;;  %v571_v16 = vld [vmem:[#allocation2 + $0x2a8] sm:$0xff]  ;;  %v572_v21 = vld [vmem:[#allocation2 + $0x2b0] sm:$0xff] }
  0x41   :  { %2944 = vmatpush3.bf16.msra.mxu1 %v2941_v43  ;;  %v3045_v43 = vpack.c.bf16 %v567_v42, %v566_v40  ;;  %v570_v15 = vld [vmem:[#allocation2 + $0x2a0] sm:$0xff]  ;;  %v476_v32 = vld [vmem:[#allocation2 + $0x258] sm:$0xff]  ;;  %v478_v38 = vld [vmem:[#allocation2 + $0x268] sm:$0xff] }
  0x42   :  { %2912 = vmatpush3.bf16.msra.mxu0 %v2909_v44  ;;  %2946 = vmatprep.subr.bf16.mxu1 %v2945_v49  ;;  %v70_v44 = vlaneseq  ;;  %v3053_v20 = vpack.c.bf16 %v571_v16, %v570_v15  ;;  %v473_v24 = vld [vmem:[#allocation2 + $0x240] sm:$0xff]  ;;  %v577_v35 = vld [vmem:[#allocation2 + $0x2d8] sm:$0xff] }
  0x43   :  { %2914 = vmatprep.subr.bf16.mxu0 %v2913_v50  ;;  %v574_v27 = vld [vmem:[#allocation2 + $0x2c0] sm:$0xff] }
  0x44   :  { %v3591_v45 = vshrl.u32 %v70_v44, 7  ;;  %v578_v40 = vld [vmem:[#allocation2 + $0x2e0] sm:$0xff]  ;;  %v480_v44 = vld [vmem:[#allocation2 + $0x278] sm:$0xff] }
  0x45   :  { %2948 = vmatpush3.bf16.msra.mxu1 %v2945_v49  ;;  %v52_v15 = vld [vmem:[%s3746_s1] sm:$0xff] }
  0x46   :  { %2916 = vmatpush3.bf16.msra.mxu0 %v2913_v50  ;;  %2982 = vmatprep.subr.bf16.mxu1 %v2981_v57  ;;  %v72_v46 = vsub.s32 0, %v3591_v45  ;;  %v1909_v16 = vld [vmem:[%s3749_s4 + $0x60] sm:$0xff] }
  0x47   :  { %2950 = vmatprep.subr.bf16.mxu0 %v2949_v58 }
  0x48   :  { %2323 = vmatmul.mubr.f32.vlgmr.msra.gmra.mrb[0].mxu1 %v152_v61  ;;  %v173_v49 = vrot.slane %v3594_v47, %v72_v46  ;;  %v73_v50 = vrot.slane %v3596_v48, %v72_v46 }
  0x49   :  { %2288 = vmatmul.mubr.f32.vlgmr.msra.gmra.mrb[0].mxu0 %v51_v55  ;;  %2984 = vmatpush3.bf16.msra.mxu1 %v2981_v57 }
  0x4a   :  { %2952 = vmatpush3.bf16.msra.mxu0 %v2949_v58  ;;  %2986 = vmatprep.subr.bf16.mxu1 %v2985_v0 }
  0x4b   :  { %2954 = vmatprep.subr.bf16.mxu0 %v2953_v1 }
  0x4d   :  { %2988 = vmatpush3.bf16.msra.mxu1 %v2985_v0 }
  0x4e   :  { %2956 = vmatpush3.bf16.msra.mxu0 %v2953_v1  ;;  %2990 = vmatprep.subr.bf16.mxu1 %v2989_v6  ;;  %v467_v1 = vld [vmem:[#allocation2 + $0x210] sm:$0xff] }
  0x4f   :  { %2958 = vmatprep.subr.bf16.mxu0 %v2957_v7  ;;  %v3017_v9 = vpack.c.bf16 %v468_v2, %v467_v1 }
  0x51   :  { %2992 = vmatpush3.bf16.msra.mxu1 %v2989_v6 }
  0x52   :  { %2960 = vmatpush3.bf16.msra.mxu0 %v2957_v7  ;;  %2994 = vmatprep.subr.bf16.mxu1 %v2993_v12  ;;  %v568_v7 = vld [vmem:[#allocation2 + $0x290] sm:$0xff] }
  0x53   :  { %2962 = vmatprep.subr.bf16.mxu0 %v2961_v13  ;;  %v3049_v14 = vpack.c.bf16 %v569_v8, %v568_v7 }
  0x55   :  { %2996 = vmatpush3.bf16.msra.mxu1 %v2993_v12  ;;  %v470_v12 = vld [vmem:[#allocation2 + $0x228] sm:$0xff] }
  0x56   :  { %2964 = vmatpush3.bf16.msra.mxu0 %v2961_v13  ;;  %2998 = vmatprep.subr.bf16.mxu1 %v2997_v18  ;;  %v3021_v17 = vpack.c.bf16 %v470_v12, %v469_v11  ;;  %v673_v11 = vld [vmem:[#allocation2 + $0x310] sm:$0xff]  ;;  %v674_v12 = vld [vmem:[#allocation2 + $0x318] sm:$0xff] }
  0x57   :  { %2966 = vmatprep.subr.bf16.mxu0 %v2965_v19 }
  0x59   :  { %3000 = vmatpush3.bf16.msra.mxu1 %v2997_v18  ;;  %v471_v18 = vld [vmem:[#allocation2 + $0x230] sm:$0xff] }
  0x5a   :  { %2968 = vmatpush3.bf16.msra.mxu0 %v2965_v19  ;;  %3002 = vmatprep.subr.bf16.mxu1 %v3001_v25  ;;  %v472_v19 = vld [vmem:[#allocation2 + $0x238] sm:$0xff] }
  0x5b   :  { %2970 = vmatprep.subr.bf16.mxu0 %v2969_v22  ;;  %v3025_v23 = vpack.c.bf16 %v472_v19, %v471_v18  ;;  %v774_v19 = vld [vmem:[#allocation2 + $0x390] sm:$0xff] }
  0x5d   :  { %3004 = vmatpush3.bf16.msra.mxu1 %v3001_v25  ;;  %v474_v25 = vld [vmem:[#allocation2 + $0x248] sm:$0xff] }
  0x5e   :  { %2972 = vmatpush3.bf16.msra.mxu0 %v2969_v22  ;;  %3006 = vmatprep.subr.bf16.mxu1 %v3005_v31  ;;  %v573_v22 = vld [vmem:[#allocation2 + $0x2b8] sm:$0xff]  ;;  %v3029_v29 = vpack.c.bf16 %v474_v25, %v473_v24  ;;  %v676_v24 = vld [vmem:[#allocation2 + $0x328] sm:$0xff]  ;;  %v769_v25 = vmul.f32 %v1909_v16, %v52_v15  ;;  %v881_v16 = vld [vmem:[#allocation2 + $0x420] sm:$0xff] }
  0x5f   :  { %2974 = vmatprep.subr.bf16.mxu0 %v2973_v28  ;;  %v3057_v26 = vpack.c.bf16 %v573_v22, %v572_v21  ;;  %v3081_v21 = vpack.c.bf16 %v674_v12, %v673_v11  ;;  %v880_v11 = vld [vmem:[#allocation2 + $0x418] sm:$0xff]  ;;  %v980_v12 = vld [vmem:[#allocation2 + $0x490] sm:$0xff] }
  0x61   :  { %3008 = vmatpush3.bf16.msra.mxu1 %v3005_v31  ;;  %v475_v31 = vld [vmem:[#allocation2 + $0x250] sm:$0xff] }
  0x62   :  { %2976 = vmatpush3.bf16.msra.mxu0 %v2973_v28  ;;  %3010 = vmatprep.subr.bf16.mxu1 %v3009_v37  ;;  %v575_v28 = vld [vmem:[#allocation2 + $0x2c8] sm:$0xff]  ;;  %v3033_v33 = vpack.c.bf16 %v476_v32, %v475_v31  ;;  %v677_v31 = vld [vmem:[#allocation2 + $0x330] sm:$0xff]  ;;  %v678_v32 = vld [vmem:[#allocation2 + $0x338] sm:$0xff] }
  0x63   :  { %2978 = vmatprep.subr.bf16.mxu0 %v2977_v34  ;;  %v3061_v30 = vpack.c.bf16 %v575_v28, %v574_v27  ;;  %v776_v28 = vld [vmem:[#allocation2 + $0x3a0] sm:$0xff] }
  0x65   :  { %3012 = vmatpush3.bf16.msra.mxu1 %v3009_v37  ;;  %v477_v37 = vld [vmem:[#allocation2 + $0x260] sm:$0xff] }
  0x66   :  { %2980 = vmatpush3.bf16.msra.mxu0 %v2977_v34  ;;  %3046 = vmatprep.subr.bf16.mxu1 %v3045_v43  ;;  %v576_v34 = vld [vmem:[#allocation2 + $0x2d0] sm:$0xff]  ;;  %v3037_v39 = vpack.c.bf16 %v478_v38, %v477_v37  ;;  %v679_v37 = vld [vmem:[#allocation2 + $0x340] sm:$0xff]  ;;  %v680_v38 = vld [vmem:[#allocation2 + $0x348] sm:$0xff] }
  0x67   :  { %3014 = vmatprep.subr.bf16.mxu0 %v3013_v41  ;;  %v3065_v36 = vpack.c.bf16 %v577_v35, %v576_v34  ;;  %v778_v34 = vld [vmem:[#allocation2 + $0x3b0] sm:$0xff]  ;;  %v779_v35 = vld [vmem:[#allocation2 + $0x3b8] sm:$0xff] }
 0x11b   :  { %v2324_v51 = vpop.f32.mrb[0].mxu1 }
 0x11c   :  { %v246_v53 = vadd.f32 %v2324_v51, %v173_v49  ;;  %v2289_v54 = vpop.f32.mrb[0].mxu0  ;;  %v240_v55 = vpop.f32.mrb[1].mxu1 }
 0x11d   :  { %v146_v57 = vadd.f32 %v2289_v54, %v73_v50  ;;  %v241_v58 = vadd.f32 %v240_v55, %v173_v49  ;;  %v140_v59 = vpop.f32.mrb[1].mxu0  ;;  %v580_v49 = vld [vmem:[#allocation2 + $0x2f0] sm:$0xff]  ;;  %v671_v55 = vld [vmem:[#allocation2 + $0x300] sm:$0xff] }
 0x11e   :  { %v253_v60 = vmul.f32 %v1900_v52, %v246_v53  ;;  %v141_v61 = vadd.f32 %v140_v59, %v73_v50  ;;  %v581_v50 = vld [vmem:[#allocation2 + $0x2f8] sm:$0xff]  ;;  %v772_v52 = vld [vmem:[#allocation2 + $0x380] sm:$0xff]  ;;  %v773_v53 = vld [vmem:[#allocation2 + $0x388] sm:$0xff] }
 0x11f   :  { %v252_v62 = vmul.f32 %v1899_v56, %v241_v58  ;;  %v3073_v51 = vpack.c.bf16 %v581_v50, %v580_v49  ;;  %v3109_v54 = vpack.c.bf16 %v773_v53, %v772_v52  ;;  %v672_v56 = vld [vmem:[#allocation2 + $0x308] sm:$0xff]  ;;  %v277_v58 = vsub.s32 1, %v3591_v45  ;;  %v782_v49 = vld [vmem:[#allocation2 + $0x3d0] sm:$0xff]  ;;  %v783_v50 = vld [vmem:[#allocation2 + $0x3d8] sm:$0xff] }
 0x120   :  { %v255_v63 = vadd.f32 %v253_v60, %v146_v57  ;;  %v3077_v57 = vpack.c.bf16 %v672_v56, %v671_v55  ;;  %v683_v52 = vld [vmem:[#allocation2 + $0x360] sm:$0xff]  ;;  %v684_v53 = vld [vmem:[#allocation2 + $0x368] sm:$0xff] }
 0x121   :  { %v254_v0 = vadd.f32 %v252_v62, %v141_v61  ;;  %v379_v59 = vrot.slane %v3594_v47, %v277_v58  ;;  %v278_v61 = vrot.slane %v3596_v48, %v277_v58  ;;  %v784_v55 = vld [vmem:[#allocation2 + $0x3e0] sm:$0xff]  ;;  %v785_v56 = vld [vmem:[#allocation2 + $0x3e8] sm:$0xff]  ;;  %v685_v58 = vld [vmem:[#allocation2 + $0x370] sm:$0xff] }
 0x122   :  { %v257_v3 = vmax.f32 %v255_v63, 0.0 }
 0x123   :  { %v256_v6 = vmax.f32 %v254_v0, 0.0  ;;  %v1904_v0 = vld [vmem:[%s3749_s4 + $0x38] sm:$0xff] }
 0x124   :  { %v358_v13 = vmul.f32 %v1902_v5, %v257_v3 }
 0x125   :  { %2357 = vmatprep.mubr.f32.mxu0 %v256_v6  ;;  %v357_v10 = vmul.f32 %v1901_v4, %v256_v6 }
 0x126   :  { %2358 = vmatmul.mubr.f32.vlgmr.msra.gmra.mrb[2].mxu0 %v257_v3  ;;  %v1903_v3 = vld [vmem:[%s3749_s4 + $0x30] sm:$0xff] }
 0x127   :  { %2392 = vmatprep.mubr.f32.mxu1 %v357_v10  ;;  %3016 = vmatpush3.bf16.msra.mxu0 %v3013_v41  ;;  %v579_v41 = vld [vmem:[#allocation2 + $0x2e8] sm:$0xff] }
 0x128   :  { %2393 = vmatmul.mubr.f32.vlgmr.msra.gmra.mrb[2].mxu1 %v358_v13  ;;  %3018 = vmatprep.subr.bf16.mxu0 %v3017_v9  ;;  %v3069_v42 = vpack.c.bf16 %v579_v41, %v578_v40  ;;  %v780_v40 = vld [vmem:[#allocation2 + $0x3c0] sm:$0xff]  ;;  %v781_v41 = vld [vmem:[#allocation2 + $0x3c8] sm:$0xff] }
 0x129   :  { %3048 = vmatpush3.bf16.msra.mxu1 %v3045_v43  ;;  %v479_v43 = vld [vmem:[#allocation2 + $0x270] sm:$0xff] }
 0x12a   :  { %3050 = vmatprep.subr.bf16.mxu1 %v3049_v14  ;;  %v3041_v46 = vpack.c.bf16 %v480_v44, %v479_v43  ;;  %v681_v43 = vld [vmem:[#allocation2 + $0x350] sm:$0xff]  ;;  %v682_v44 = vld [vmem:[#allocation2 + $0x358] sm:$0xff] }
 0x12b   :  { %3020 = vmatpush3.bf16.msra.mxu0 %v3017_v9 }
 0x12c   :  { %3022 = vmatprep.subr.bf16.mxu0 %v3021_v17 }
 0x12d   :  { %3052 = vmatpush3.bf16.msra.mxu1 %v3049_v14  ;;  %v1905_v14 = vld [vmem:[%s3749_s4 + $0x40] sm:$0xff] }
 0x12e   :  { %3054 = vmatprep.subr.bf16.mxu1 %v3053_v20 }
 0x12f   :  { %3024 = vmatpush3.bf16.msra.mxu0 %v3021_v17  ;;  %v1906_v17 = vld [vmem:[%s3749_s4 + $0x48] sm:$0xff] }
 0x130   :  { %3026 = vmatprep.subr.bf16.mxu0 %v3025_v23 }
 0x131   :  { %3056 = vmatpush3.bf16.msra.mxu1 %v3053_v20  ;;  %v775_v20 = vld [vmem:[#allocation2 + $0x398] sm:$0xff] }
 0x132   :  { %3058 = vmatprep.subr.bf16.mxu1 %v3057_v26  ;;  %v3113_v27 = vpack.c.bf16 %v775_v20, %v774_v19  ;;  %v983_v19 = vld [vmem:[#allocation2 + $0x4a8] sm:$0xff] }
 0x133   :  { %3028 = vmatpush3.bf16.msra.mxu0 %v3025_v23  ;;  %v675_v23 = vld [vmem:[#allocation2 + $0x320] sm:$0xff] }
 0x134   :  { %3030 = vmatprep.subr.bf16.mxu0 %v3029_v29 }
 0x135   :  { %3060 = vmatpush3.bf16.msra.mxu1 %v3057_v26 }
 0x136   :  { %3062 = vmatprep.subr.bf16.mxu1 %v3061_v30 }
 0x137   :  { %3032 = vmatpush3.bf16.msra.mxu0 %v3029_v29  ;;  %v777_v29 = vld [vmem:[#allocation2 + $0x3a8] sm:$0xff] }
 0x138   :  { %3034 = vmatprep.subr.bf16.mxu0 %v3033_v33 }
 0x139   :  { %3064 = vmatpush3.bf16.msra.mxu1 %v3061_v30  ;;  %v3085_v30 = vpack.c.bf16 %v676_v24, %v675_v23  ;;  %v884_v23 = vld [vmem:[#allocation2 + $0x438] sm:$0xff]  ;;  %v984_v24 = vld [vmem:[#allocation2 + $0x4b0] sm:$0xff] }
 0x13a   :  { %3066 = vmatprep.subr.bf16.mxu1 %v3065_v36 }
 0x13b   :  { %3036 = vmatpush3.bf16.msra.mxu0 %v3033_v33  ;;  %v3117_v33 = vpack.c.bf16 %v777_v29, %v776_v28  ;;  %v885_v28 = vld [vmem:[#allocation2 + $0x440] sm:$0xff]  ;;  %v886_v29 = vld [vmem:[#allocation2 + $0x448] sm:$0xff] }
 0x13c   :  { %3038 = vmatprep.subr.bf16.mxu0 %v3037_v39 }
 0x13d   :  { %3068 = vmatpush3.bf16.msra.mxu1 %v3065_v36  ;;  %v3089_v36 = vpack.c.bf16 %v678_v32, %v677_v31  ;;  %v987_v31 = vld [vmem:[#allocation2 + $0x4c8] sm:$0xff]  ;;  %v3157_v32 = vpack.c.bf16 %v886_v29, %v885_v28 }
 0x13e   :  { %3070 = vmatprep.subr.bf16.mxu1 %v3069_v42 }
 0x13f   :  { %3040 = vmatpush3.bf16.msra.mxu0 %v3037_v39  ;;  %v3121_v39 = vpack.c.bf16 %v779_v35, %v778_v34  ;;  %v887_v34 = vld [vmem:[#allocation2 + $0x450] sm:$0xff]  ;;  %v888_v35 = vld [vmem:[#allocation2 + $0x458] sm:$0xff] }
 0x140   :  { %3042 = vmatprep.subr.bf16.mxu0 %v3041_v46 }
 0x141   :  { %3072 = vmatpush3.bf16.msra.mxu1 %v3069_v42  ;;  %v3093_v42 = vpack.c.bf16 %v680_v38, %v679_v37  ;;  %v988_v37 = vld [vmem:[#allocation2 + $0x4d0] sm:$0xff]  ;;  %v989_v38 = vld [vmem:[#allocation2 + $0x4d8] sm:$0xff] }
 0x142   :  { %3074 = vmatprep.subr.bf16.mxu1 %v3073_v51 }
 0x143   :  { %3044 = vmatpush3.bf16.msra.mxu0 %v3041_v46  ;;  %v3125_v46 = vpack.c.bf16 %v781_v41, %v780_v40  ;;  %v889_v40 = vld [vmem:[#allocation2 + $0x460] sm:$0xff]  ;;  %v890_v41 = vld [vmem:[#allocation2 + $0x468] sm:$0xff] }
 0x144   :  { %3078 = vmatprep.subr.bf16.mxu0 %v3077_v57 }
 0x145   :  { %3076 = vmatpush3.bf16.msra.mxu1 %v3073_v51  ;;  %v3097_v51 = vpack.c.bf16 %v682_v44, %v681_v43  ;;  %v990_v43 = vld [vmem:[#allocation2 + $0x4e0] sm:$0xff]  ;;  %v991_v44 = vld [vmem:[#allocation2 + $0x4e8] sm:$0xff] }
 0x146   :  { %3110 = vmatprep.subr.bf16.mxu1 %v3109_v54 }
 0x1f9   :  { %v2359_v60 = vpop.f32.mrb[2].mxu0 }
 0x1fa   :  { %v345_v62 = vpop.f32.mrb[3].mxu0  ;;  %v351_v5 = vadd.f32 %v2359_v60, %v278_v61  ;;  %v3133_v60 = vpack.c.bf16 %v785_v56, %v784_v55  ;;  %v1083_v55 = vld [vmem:[#allocation2 + $0x500] sm:$0xff]  ;;  %v1084_v56 = vld [vmem:[#allocation2 + $0x508] sm:$0xff] }
 0x1fb   :  { %v2394_v63 = vpop.f32.mrb[2].mxu1  ;;  %v346_v7 = vadd.f32 %v345_v62, %v278_v61  ;;  %v786_v61 = vld [vmem:[#allocation2 + $0x3f0] sm:$0xff]  ;;  %v787_v62 = vld [vmem:[#allocation2 + $0x3f8] sm:$0xff] }
 0x1fc   :  { %v452_v1 = vadd.f32 %v2394_v63, %v379_v59  ;;  %v446_v2 = vpop.f32.mrb[3].mxu1 }
 0x1fd   :  { %v447_v4 = vadd.f32 %v446_v2, %v379_v59  ;;  %v686_v59 = vld [vmem:[#allocation2 + $0x378] sm:$0xff]  ;;  %v1910_v2 = vld [vmem:[%s3749_s4 + $0x68] sm:$0xff] }
 0x1fe   :  { %v459_v6 = vmul.f32 %v1904_v0, %v452_v1  ;;  %v3105_v63 = vpack.c.bf16 %v686_v59, %v685_v58  ;;  %v3137_v0 = vpack.c.bf16 %v787_v62, %v786_v61  ;;  %v53_v1 = vld [vmem:[%s3746_s1 + $0x8] sm:$0xff]  ;;  %v3205_v58 = vpack.c.bf16 %v1084_v56, %v1083_v55  ;;  %v1191_v55 = vld [vmem:[#allocation2 + $0x5b8] sm:$0xff] }
 0x1ff   :  { %v458_v8 = vmul.f32 %v1903_v3, %v447_v4  ;;  %v770_v3 = vmul.f32 %v1910_v2, %v53_v1  ;;  %v877_v4 = vld [vmem:[#allocation2 + $0x400] sm:$0xff]  ;;  %v1185_v59 = vld [vmem:[#allocation2 + $0x588] sm:$0xff]  ;;  %v483_v61 = vsub.s32 2, %v3591_v45 }
 0x200   :  { %v461_v9 = vadd.f32 %v459_v6, %v351_v5  ;;  %v878_v5 = vld [vmem:[#allocation2 + $0x408] sm:$0xff] }
 0x201   :  { %v460_v10 = vadd.f32 %v458_v8, %v346_v7  ;;  %v3141_v6 = vpack.c.bf16 %v878_v5, %v877_v4  ;;  %v978_v7 = vld [vmem:[#allocation2 + $0x480] sm:$0xff]  ;;  %v979_v8 = vld [vmem:[#allocation2 + $0x488] sm:$0xff]  ;;  %v585_v62 = vrot.slane %v3594_v47, %v483_v61 }
 0x202   :  { %v463_v13 = vmax.f32 %v461_v9, 0.0  ;;  %v879_v9 = vld [vmem:[#allocation2 + $0x410] sm:$0xff] }
 0x203   :  { %v462_v18 = vmax.f32 %v460_v10, 0.0  ;;  %v3173_v10 = vpack.c.bf16 %v979_v8, %v978_v7 }
 0x204   :  { %v564_v26 = vmul.f32 %v1906_v17, %v463_v13  ;;  %v882_v17 = vld [vmem:[#allocation2 + $0x428] sm:$0xff] }
 0x205   :  { %2427 = vmatprep.mubr.f32.mxu0 %v462_v18  ;;  %v563_v22 = vmul.f32 %v1905_v14, %v462_v18  ;;  %v3145_v14 = vpack.c.bf16 %v880_v11, %v879_v9  ;;  %v982_v18 = vld [vmem:[#allocation2 + $0x4a0] sm:$0xff]  ;;  %v3149_v20 = vpack.c.bf16 %v882_v17, %v881_v16 }
 0x206   :  { %2428 = vmatmul.mubr.f32.vlgmr.msra.gmra.mrb[4].mxu0 %v463_v13  ;;  %v981_v13 = vld [vmem:[#allocation2 + $0x498] sm:$0xff] }
 0x207   :  { %2462 = vmatprep.mubr.f32.mxu1 %v563_v22  ;;  %3080 = vmatpush3.bf16.msra.mxu0 %v3077_v57  ;;  %v3101_v57 = vpack.c.bf16 %v684_v53, %v683_v52  ;;  %v883_v22 = vld [vmem:[#allocation2 + $0x430] sm:$0xff]  ;;  %v993_v53 = vld [vmem:[#allocation2 + $0x4f8] sm:$0xff] }
 0x208   :  { %2463 = vmatmul.mubr.f32.vlgmr.msra.gmra.mrb[4].mxu1 %v564_v26  ;;  %3082 = vmatprep.subr.bf16.mxu0 %v3081_v21  ;;  %v3153_v26 = vpack.c.bf16 %v884_v23, %v883_v22  ;;  %v992_v52 = vld [vmem:[#allocation2 + $0x4f0] sm:$0xff] }
 0x209   :  { %3112 = vmatpush3.bf16.msra.mxu1 %v3109_v54  ;;  %2532 = vmatprep.mubr.f32.mxu1 %v769_v25  ;;  %v3129_v54 = vpack.c.bf16 %v783_v50, %v782_v49  ;;  %v985_v25 = vld [vmem:[#allocation2 + $0x4b8] sm:$0xff]  ;;  %v891_v49 = vld [vmem:[#allocation2 + $0x470] sm:$0xff] }
 0x20a   :  { %3114 = vmatprep.subr.bf16.mxu1 %v3113_v27  ;;  %2497 = vmatprep.mubr.f32.mxu0 %v52_v15  ;;  %v3177_v15 = vpack.c.bf16 %v981_v13, %v980_v12  ;;  %v892_v50 = vld [vmem:[#allocation2 + $0x478] sm:$0xff] }
 0x20b   :  { %3084 = vmatpush3.bf16.msra.mxu0 %v3081_v21  ;;  %v3181_v21 = vpack.c.bf16 %v983_v19, %v982_v18 }
 0x20c   :  { %3086 = vmatprep.subr.bf16.mxu0 %v3085_v30 }
 0x20d   :  { %3116 = vmatpush3.bf16.msra.mxu1 %v3113_v27  ;;  %v3185_v27 = vpack.c.bf16 %v985_v25, %v984_v24  ;;  %v1911_v24 = vld [vmem:[%s3749_s4 + $0x70] sm:$0xff] }
 0x20e   :  { %3118 = vmatprep.subr.bf16.mxu1 %v3117_v33 }
 0x20f   :  { %3088 = vmatpush3.bf16.msra.mxu0 %v3085_v30  ;;  %v986_v30 = vld [vmem:[#allocation2 + $0x4c0] sm:$0xff] }
 0x210   :  { %3090 = vmatprep.subr.bf16.mxu0 %v3089_v36 }
 0x211   :  { %3120 = vmatpush3.bf16.msra.mxu1 %v3117_v33  ;;  %v3189_v33 = vpack.c.bf16 %v987_v31, %v986_v30  ;;  %v1085_v31 = vld [vmem:[#allocation2 + $0x510] sm:$0xff] }
 0x212   :  { %3122 = vmatprep.subr.bf16.mxu1 %v3121_v39 }
 0x213   :  { %3092 = vmatpush3.bf16.msra.mxu0 %v3089_v36  ;;  %v3161_v36 = vpack.c.bf16 %v888_v35, %v887_v34  ;;  %v1913_v34 = vld [vmem:[%s3749_s4 + $0x80] sm:$0xff]  ;;  %v1914_v35 = vld [vmem:[%s3749_s4 + $0x88] sm:$0xff] }
 0x214   :  { %3094 = vmatprep.subr.bf16.mxu0 %v3093_v42 }
 0x215   :  { %3124 = vmatpush3.bf16.msra.mxu1 %v3121_v39  ;;  %v3193_v39 = vpack.c.bf16 %v989_v38, %v988_v37  ;;  %v1186_v37 = vld [vmem:[#allocation2 + $0x590] sm:$0xff]  ;;  %v1187_v38 = vld [vmem:[#allocation2 + $0x598] sm:$0xff] }
 0x216   :  { %3126 = vmatprep.subr.bf16.mxu1 %v3125_v46 }
 0x217   :  { %3096 = vmatpush3.bf16.msra.mxu0 %v3093_v42  ;;  %v3165_v42 = vpack.c.bf16 %v890_v41, %v889_v40  ;;  %v1087_v41 = vld [vmem:[#allocation2 + $0x520] sm:$0xff] }
 0x218   :  { %3098 = vmatprep.subr.bf16.mxu0 %v3097_v51 }
 0x219   :  { %3128 = vmatpush3.bf16.msra.mxu1 %v3125_v46  ;;  %v3197_v46 = vpack.c.bf16 %v991_v44, %v990_v43  ;;  %v3241_v44 = vpack.c.bf16 %v1187_v38, %v1186_v37 }
 0x21a   :  { %3130 = vmatprep.subr.bf16.mxu1 %v3129_v54 }
 0x21b   :  { %3100 = vmatpush3.bf16.msra.mxu0 %v3097_v51  ;;  %v3169_v51 = vpack.c.bf16 %v892_v50, %v891_v49  ;;  %v1189_v49 = vld [vmem:[#allocation2 + $0x5a8] sm:$0xff] }
 0x21c   :  { %3102 = vmatprep.subr.bf16.mxu0 %v3101_v57 }
 0x21d   :  { %3132 = vmatpush3.bf16.msra.mxu1 %v3129_v54  ;;  %v3201_v54 = vpack.c.bf16 %v993_v53, %v992_v52  ;;  %v1090_v52 = vld [vmem:[#allocation2 + $0x538] sm:$0xff] }
 0x21e   :  { %3134 = vmatprep.subr.bf16.mxu1 %v3133_v60 }
 0x21f   :  { %3104 = vmatpush3.bf16.msra.mxu0 %v3101_v57  ;;  %v1184_v57 = vld [vmem:[#allocation2 + $0x580] sm:$0xff] }
 0x220   :  { %3106 = vmatprep.subr.bf16.mxu0 %v3105_v63 }
 0x221   :  { %3136 = vmatpush3.bf16.msra.mxu1 %v3133_v60  ;;  %v3237_v60 = vpack.c.bf16 %v1185_v59, %v1184_v57  ;;  %v1091_v57 = vld [vmem:[#allocation2 + $0x540] sm:$0xff]  ;;  %v1092_v59 = vld [vmem:[#allocation2 + $0x548] sm:$0xff] }
 0x222   :  { %3138 = vmatprep.subr.bf16.mxu1 %v3137_v0 }
 0x223   :  { %3108 = vmatpush3.bf16.msra.mxu0 %v3105_v63 }
 0x224   :  { %3142 = vmatprep.subr.bf16.mxu0 %v3141_v6 }
 0x225   :  { %3140 = vmatpush3.bf16.msra.mxu1 %v3137_v0  ;;  %v484_v0 = vrot.slane %v3596_v48, %v483_v61  ;;  %v1192_v61 = vld [vmem:[#allocation2 + $0x5c0] sm:$0xff] }
 0x226   :  { %2498 = vmatmul.mubr.f32.vlgmr.msra.gmra.mrb[6].mxu0 %v53_v1  ;;  %3174 = vmatprep.subr.bf16.mxu1 %v3173_v10 }
 0x227   :  { %3144 = vmatpush3.bf16.msra.mxu0 %v3141_v6  ;;  %v1907_v6 = vld [vmem:[%s3749_s4 + $0x50] sm:$0xff] }
 0x228   :  { %2533 = vmatmul.mubr.f32.vlgmr.msra.gmra.mrb[6].mxu1 %v770_v3  ;;  %3146 = vmatprep.subr.bf16.mxu0 %v3145_v14  ;;  %v1908_v3 = vld [vmem:[%s3749_s4 + $0x58] sm:$0xff] }
 0x229   :  { %3176 = vmatpush3.bf16.msra.mxu1 %v3173_v10 }
 0x22a   :  { %3178 = vmatprep.subr.bf16.mxu1 %v3177_v15 }
 0x22b   :  { %3148 = vmatpush3.bf16.msra.mxu0 %v3145_v14  ;;  %v689_v14 = vsub.s32 3, %v3591_v45 }
 0x22c   :  { %3150 = vmatprep.subr.bf16.mxu0 %v3149_v20 }
 0x22d   :  { %3180 = vmatpush3.bf16.msra.mxu1 %v3177_v15  ;;  %v791_v15 = vrot.slane %v3594_v47, %v689_v14  ;;  %v690_v16 = vrot.slane %v3596_v48, %v689_v14  ;;  %v1097_v14 = vld [vmem:[#allocation2 + $0x570] sm:$0xff] }
 0x22e   :  { %3182 = vmatprep.subr.bf16.mxu1 %v3181_v21 }
 0x22f   :  { %3152 = vmatpush3.bf16.msra.mxu0 %v3149_v20  ;;  %v1912_v20 = vld [vmem:[%s3749_s4 + $0x78] sm:$0xff] }
 0x230   :  { %3154 = vmatprep.subr.bf16.mxu0 %v3153_v26 }
 0x231   :  { %3184 = vmatpush3.bf16.msra.mxu1 %v3181_v21 }
 0x232   :  { %3186 = vmatprep.subr.bf16.mxu1 %v3185_v27 }
 0x233   :  { %3156 = vmatpush3.bf16.msra.mxu0 %v3153_v26 }
 0x234   :  { %3158 = vmatprep.subr.bf16.mxu0 %v3157_v32 }
 0x235   :  { %3188 = vmatpush3.bf16.msra.mxu1 %v3185_v27 }
 0x236   :  { %3190 = vmatprep.subr.bf16.mxu1 %v3189_v33 }
 0x237   :  { %3160 = vmatpush3.bf16.msra.mxu0 %v3157_v32  ;;  %v1086_v32 = vld [vmem:[#allocation2 + $0x518] sm:$0xff] }
 0x238   :  { %3162 = vmatprep.subr.bf16.mxu0 %v3161_v36 }
 0x239   :  { %3192 = vmatpush3.bf16.msra.mxu1 %v3189_v33 }
 0x23a   :  { %3194 = vmatprep.subr.bf16.mxu1 %v3193_v39 }
 0x23b   :  { %3164 = vmatpush3.bf16.msra.mxu0 %v3161_v36 }
 0x23c   :  { %3166 = vmatprep.subr.bf16.mxu0 %v3165_v42 }
 0x23d   :  { %3196 = vmatpush3.bf16.msra.mxu1 %v3193_v39  ;;  %v3209_v39 = vpack.c.bf16 %v1086_v32, %v1085_v31  ;;  %v1916_v32 = vld [vmem:[%s3749_s4 + $0x98] sm:$0xff] }
 0x23e   :  { %3198 = vmatprep.subr.bf16.mxu1 %v3197_v46 }
 0x23f   :  { %3168 = vmatpush3.bf16.msra.mxu0 %v3165_v42  ;;  %v1088_v42 = vld [vmem:[#allocation2 + $0x528] sm:$0xff] }
 0x240   :  { %3170 = vmatprep.subr.bf16.mxu0 %v3169_v51  ;;  %v3213_v50 = vpack.c.bf16 %v1088_v42, %v1087_v41  ;;  %v1309_v42 = vld [vmem:[#allocation2 + $0x698] sm:$0xff] }
 0x241   :  { %3200 = vmatpush3.bf16.msra.mxu1 %v3197_v46  ;;  %v1188_v46 = vld [vmem:[#allocation2 + $0x5a0] sm:$0xff] }
 0x242   :  { %3202 = vmatprep.subr.bf16.mxu1 %v3201_v54  ;;  %v3245_v53 = vpack.c.bf16 %v1189_v49, %v1188_v46  ;;  %v1918_v46 = vld [vmem:[%s3749_s4 + $0xa8] sm:$0xff] }
 0x243   :  { %3172 = vmatpush3.bf16.msra.mxu0 %v3169_v51  ;;  %v1089_v51 = vld [vmem:[#allocation2 + $0x530] sm:$0xff] }
 0x244   :  { %3206 = vmatprep.subr.bf16.mxu0 %v3205_v58  ;;  %v3217_v56 = vpack.c.bf16 %v1090_v52, %v1089_v51  ;;  %v1509_v51 = vld [vmem:[#allocation2 + $0x798] sm:$0xff] }
 0x245   :  { %3204 = vmatpush3.bf16.msra.mxu1 %v3201_v54  ;;  %v1190_v54 = vld [vmem:[#allocation2 + $0x5b0] sm:$0xff] }
 0x246   :  { %3238 = vmatprep.subr.bf16.mxu1 %v3237_v60 }
 0x2d9   :  { %v2429_v63 = vpop.f32.mrb[4].mxu0 }
 0x2da   :  { %v551_v1 = vpop.f32.mrb[5].mxu0  ;;  %v557_v8 = vadd.f32 %v2429_v63, %v484_v0  ;;  %v3221_v63 = vpack.c.bf16 %v1092_v59, %v1091_v57  ;;  %v1510_v59 = vld [vmem:[#allocation2 + $0x7a0] sm:$0xff] }
 0x2db   :  { %v2464_v2 = vpop.f32.mrb[4].mxu1  ;;  %v552_v10 = vadd.f32 %v551_v1, %v484_v0  ;;  %v1093_v0 = vld [vmem:[#allocation2 + $0x550] sm:$0xff]  ;;  %v1094_v1 = vld [vmem:[#allocation2 + $0x558] sm:$0xff] }
 0x2dc   :  { %v658_v4 = vadd.f32 %v2464_v2, %v585_v62  ;;  %v652_v5 = vpop.f32.mrb[5].mxu1  ;;  %v3225_v2 = vpack.c.bf16 %v1094_v1, %v1093_v0  ;;  %v1512_v0 = vld [vmem:[#allocation2 + $0x7b0] sm:$0xff]  ;;  %v1513_v1 = vld [vmem:[#allocation2 + $0x7b8] sm:$0xff] }
 0x2dd   :  { %v653_v7 = vadd.f32 %v652_v5, %v585_v62  ;;  %v1193_v62 = vld [vmem:[#allocation2 + $0x5c8] sm:$0xff] }
 0x2de   :  { %v665_v9 = vmul.f32 %v1908_v3, %v658_v4  ;;  %v1194_v3 = vld [vmem:[#allocation2 + $0x5d0] sm:$0xff]  ;;  %v1195_v4 = vld [vmem:[#allocation2 + $0x5d8] sm:$0xff] }
 0x2df   :  { %v664_v11 = vmul.f32 %v1907_v6, %v653_v7  ;;  %v3257_v5 = vpack.c.bf16 %v1195_v4, %v1194_v3  ;;  %v1095_v6 = vld [vmem:[#allocation2 + $0x560] sm:$0xff]  ;;  %v1096_v7 = vld [vmem:[#allocation2 + $0x568] sm:$0xff] }
 0x2e0   :  { %v3648_v12 = vadd.f32 %v665_v9, %v557_v8  ;;  %v3229_v8 = vpack.c.bf16 %v1096_v7, %v1095_v6  ;;  %v1196_v9 = vld [vmem:[#allocation2 + $0x5e0] sm:$0xff]  ;;  %v1315_v4 = vld [vmem:[#allocation2 + $0x6c8] sm:$0xff] }
 0x2e1   :  { %v3650_v13 = vadd.f32 %v664_v11, %v552_v10  ;;  %v1197_v10 = vld [vmem:[#allocation2 + $0x5e8] sm:$0xff]  ;;  %v1314_v3 = vld [vmem:[#allocation2 + $0x6c0] sm:$0xff] }
 0x2e2   :  { %v3261_v11 = vpack.c.bf16 %v1197_v10, %v1196_v9  ;;  %v1514_v6 = vld [vmem:[#allocation2 + $0x7c0] sm:$0xff]  ;;  %v1515_v7 = vld [vmem:[#allocation2 + $0x7c8] sm:$0xff]  ;;  %v1316_v10 = vld [vmem:[#allocation2 + $0x6d0] sm:$0xff] }
 0x2e3   :  { %v3349_v9 = vpack.c.bf16 %v1515_v7, %v1514_v6 }
 0x2f9   :  { %v2499_v17 = vpop.f32.mrb[6].mxu0 }
 0x2fa   :  { %v757_v18 = vpop.f32.mrb[7].mxu0  ;;  %v763_v22 = vadd.f32 %v2499_v17, %v690_v16  ;;  %v1198_v17 = vld [vmem:[#allocation2 + $0x5f0] sm:$0xff] }
 0x2fb   :  { %v2534_v19 = vpop.f32.mrb[6].mxu1  ;;  %v758_v26 = vadd.f32 %v757_v18, %v690_v16  ;;  %v1199_v18 = vld [vmem:[#allocation2 + $0x5f8] sm:$0xff] }
 0x2fc   :  { %v864_v21 = vadd.f32 %v2534_v19, %v791_v15  ;;  %v858_v23 = vpop.f32.mrb[7].mxu1  ;;  %v3265_v19 = vpack.c.bf16 %v1199_v18, %v1198_v17  ;;  %v1318_v18 = vld [vmem:[#allocation2 + $0x6e0] sm:$0xff] }
 0x2fd   :  { %v859_v25 = vadd.f32 %v858_v23, %v791_v15  ;;  %v1098_v15 = vld [vmem:[#allocation2 + $0x578] sm:$0xff] }
 0x2fe   :  { %v871_v27 = vmul.f32 %v1912_v20, %v864_v21  ;;  %v3233_v16 = vpack.c.bf16 %v1098_v15, %v1097_v14  ;;  %v1306_v20 = vld [vmem:[#allocation2 + $0x680] sm:$0xff]  ;;  %v1307_v21 = vld [vmem:[#allocation2 + $0x688] sm:$0xff]  ;;  %v1516_v15 = vld [vmem:[#allocation2 + $0x7d0] sm:$0xff] }
 0x2ff   :  { %v870_v28 = vmul.f32 %v1911_v24, %v859_v25  ;;  %v3269_v23 = vpack.c.bf16 %v1307_v21, %v1306_v20  ;;  %v1507_v24 = vld [vmem:[#allocation2 + $0x788] sm:$0xff]  ;;  %v1518_v21 = vld [vmem:[#allocation2 + $0x7e0] sm:$0xff] }
 0x300   :  { %v873_v29 = vadd.f32 %v871_v27, %v763_v22  ;;  %v1506_v22 = vld [vmem:[#allocation2 + $0x780] sm:$0xff] }
 0x301   :  { %v872_v30 = vadd.f32 %v870_v28, %v758_v26  ;;  %v3333_v25 = vpack.c.bf16 %v1507_v24, %v1506_v22  ;;  %v895_v26 = vsub.s32 4, %v3591_v45  ;;  %v1519_v22 = vld [vmem:[#allocation2 + $0x7e8] sm:$0xff]  ;;  %v1320_v24 = vld [vmem:[#allocation2 + $0x6f0] sm:$0xff] }
 0x302   :  { %v875_v33 = vmax.f32 %v873_v29, 0.0 }
 0x303   :  { %v874_v36 = vmax.f32 %v872_v30, 0.0  ;;  %v997_v27 = vrot.slane %v3594_v47, %v895_v26  ;;  %v896_v29 = vrot.slane %v3596_v48, %v895_v26  ;;  %v1308_v48 = vld [vmem:[#allocation2 + $0x690] sm:$0xff] }
 0x304   :  { %v976_v43 = vmul.f32 %v1914_v35, %v875_v33  ;;  %v1915_v35 = vld [vmem:[%s3749_s4 + $0x90] sm:$0xff]  ;;  %v3273_v52 = vpack.c.bf16 %v1309_v42, %v1308_v48  ;;  %v1920_v42 = vld [vmem:[%s3749_s4 + $0xb8] sm:$0xff] }
 0x305   :  { %2567 = vmatprep.mubr.f32.mxu0 %v874_v36  ;;  %v975_v40 = vmul.f32 %v1913_v34, %v874_v36 }
 0x306   :  { %2568 = vmatmul.mubr.f32.vlgmr.msra.gmra.mrb[8].mxu0 %v875_v33 }
 0x307   :  { %2602 = vmatprep.mubr.f32.mxu1 %v975_v40  ;;  %3208 = vmatpush3.bf16.msra.mxu0 %v3205_v58  ;;  %v3249_v58 = vpack.c.bf16 %v1191_v55, %v1190_v54  ;;  %v1310_v54 = vld [vmem:[#allocation2 + $0x6a0] sm:$0xff]  ;;  %v1311_v55 = vld [vmem:[#allocation2 + $0x6a8] sm:$0xff] }
 0x308   :  { %2603 = vmatmul.mubr.f32.vlgmr.msra.gmra.mrb[8].mxu1 %v976_v43  ;;  %3210 = vmatprep.subr.bf16.mxu0 %v3209_v39 }
 0x309   :  { %3240 = vmatpush3.bf16.msra.mxu1 %v3237_v60  ;;  %v3253_v60 = vpack.c.bf16 %v1193_v62, %v1192_v61  ;;  %v3277_v61 = vpack.c.bf16 %v1311_v55, %v1310_v54  ;;  %v1312_v62 = vld [vmem:[#allocation2 + $0x6b0] sm:$0xff] }
 0x30a   :  { %3242 = vmatprep.subr.bf16.mxu1 %v3241_v44 }
 0x30b   :  { %3212 = vmatpush3.bf16.msra.mxu0 %v3209_v39 }
 0x30c   :  { %3214 = vmatprep.subr.bf16.mxu0 %v3213_v50 }
 0x30d   :  { %3244 = vmatpush3.bf16.msra.mxu1 %v3241_v44  ;;  %v1917_v44 = vld [vmem:[%s3749_s4 + $0xa0] sm:$0xff] }
 0x30e   :  { %3246 = vmatprep.subr.bf16.mxu1 %v3245_v53 }
 0x30f   :  { %3216 = vmatpush3.bf16.msra.mxu0 %v3213_v50  ;;  %v1508_v50 = vld [vmem:[#allocation2 + $0x790] sm:$0xff] }
 0x310   :  { %3218 = vmatprep.subr.bf16.mxu0 %v3217_v56  ;;  %v3337_v57 = vpack.c.bf16 %v1509_v51, %v1508_v50 }
 0x311   :  { %3248 = vmatpush3.bf16.msra.mxu1 %v3245_v53 }
 0x312   :  { %3250 = vmatprep.subr.bf16.mxu1 %v3249_v58 }
 0x313   :  { %3220 = vmatpush3.bf16.msra.mxu0 %v3217_v56 }
 0x314   :  { %3222 = vmatprep.subr.bf16.mxu0 %v3221_v63 }
 0x315   :  { %3252 = vmatpush3.bf16.msra.mxu1 %v3249_v58  ;;  %v1511_v58 = vld [vmem:[#allocation2 + $0x7a8] sm:$0xff] }
 0x316   :  { %3254 = vmatprep.subr.bf16.mxu1 %v3253_v60 }
 0x317   :  { %3224 = vmatpush3.bf16.msra.mxu0 %v3221_v63  ;;  %v1313_v63 = vld [vmem:[#allocation2 + $0x6b8] sm:$0xff] }
 0x318   :  { %3226 = vmatprep.subr.bf16.mxu0 %v3225_v2 }
 0x319   :  { %3256 = vmatpush3.bf16.msra.mxu1 %v3253_v60  ;;  %v3341_v60 = vpack.c.bf16 %v1511_v58, %v1510_v59  ;;  %v1923_v59 = vld [vmem:[%s3749_s4 + $0xd0] sm:$0xff] }
 0x31a   :  { %3258 = vmatprep.subr.bf16.mxu1 %v3257_v5 }
 0x31b   :  { %3228 = vmatpush3.bf16.msra.mxu0 %v3225_v2  ;;  %v3281_v2 = vpack.c.bf16 %v1313_v63, %v1312_v62  ;;  %v1924_v62 = vld [vmem:[%s3749_s4 + $0xd8] sm:$0xff]  ;;  %v668_v63 = vmax.f32 %v3650_v13, 0.0 }
 0x31c   :  { %3230 = vmatprep.subr.bf16.mxu0 %v3229_v8 }
 0x31d   :  { %3260 = vmatpush3.bf16.msra.mxu1 %v3257_v5  ;;  %v3345_v5 = vpack.c.bf16 %v1513_v1, %v1512_v0  ;;  %v1486_v0 = vld [vmem:[#allocation2 + $0x710] sm:$0xff]  ;;  %v1487_v1 = vld [vmem:[#allocation2 + $0x718] sm:$0xff] }
 0x31e   :  { %3262 = vmatprep.subr.bf16.mxu1 %v3261_v11  ;;  %v3369_v7 = vpack.c.bf16 %v1487_v1, %v1486_v0  ;;  %v1791_v0 = vld [vmem:[#allocation2 + $0x8a0] sm:$0xff]  ;;  %v1792_v1 = vld [vmem:[#allocation2 + $0x8a8] sm:$0xff] }
 0x31f   :  { %3232 = vmatpush3.bf16.msra.mxu0 %v3229_v8  ;;  %v3285_v8 = vpack.c.bf16 %v1315_v4, %v1314_v3  ;;  %v1921_v3 = vld [vmem:[%s3749_s4 + $0xc0] sm:$0xff] }
 0x320   :  { %3234 = vmatprep.subr.bf16.mxu0 %v3233_v16  ;;  %v1293_v4 = vld [vmem:[#allocation2 + $0x620] sm:$0xff] }
 0x321   :  { %3264 = vmatpush3.bf16.msra.mxu1 %v3261_v11  ;;  %v1317_v11 = vld [vmem:[#allocation2 + $0x6d8] sm:$0xff] }
 0x322   :  { %3266 = vmatprep.subr.bf16.mxu1 %v3265_v19  ;;  %v3289_v14 = vpack.c.bf16 %v1317_v11, %v1316_v10  ;;  %v1489_v10 = vld [vmem:[#allocation2 + $0x728] sm:$0xff]  ;;  %v1295_v11 = vld [vmem:[#allocation2 + $0x630] sm:$0xff] }
 0x323   :  { %3236 = vmatpush3.bf16.msra.mxu0 %v3233_v16  ;;  %v1517_v16 = vld [vmem:[#allocation2 + $0x7d8] sm:$0xff] }
 0x324   :  { %3270 = vmatprep.subr.bf16.mxu0 %v3269_v23  ;;  %v3353_v17 = vpack.c.bf16 %v1517_v16, %v1516_v15 }
 0x325   :  { %3268 = vmatpush3.bf16.msra.mxu1 %v3265_v19  ;;  %v1319_v19 = vld [vmem:[#allocation2 + $0x6e8] sm:$0xff] }
 0x326   :  { %3334 = vmatprep.subr.bf16.mxu1 %v3333_v25  ;;  %v3293_v20 = vpack.c.bf16 %v1319_v19, %v1318_v18  ;;  %v1491_v18 = vld [vmem:[#allocation2 + $0x738] sm:$0xff]  ;;  %v1297_v19 = vld [vmem:[#allocation2 + $0x640] sm:$0xff] }
 0x3d9   :  { %v2569_v28 = vpop.f32.mrb[8].mxu0 }
 0x3da   :  { %v963_v30 = vpop.f32.mrb[9].mxu0  ;;  %v969_v37 = vadd.f32 %v2569_v28, %v896_v29  ;;  %v1521_v28 = vld [vmem:[#allocation2 + $0x7f8] sm:$0xff] }
 0x3db   :  { %v2604_v31 = vpop.f32.mrb[8].mxu1  ;;  %v964_v39 = vadd.f32 %v963_v30, %v896_v29  ;;  %v1289_v30 = vld [vmem:[#allocation2 + $0x600] sm:$0xff] }
 0x3dc   :  { %v1070_v33 = vadd.f32 %v2604_v31, %v997_v27  ;;  %v1064_v34 = vpop.f32.mrb[9].mxu1  ;;  %v1290_v31 = vld [vmem:[#allocation2 + $0x608] sm:$0xff] }
 0x3dd   :  { %v1065_v36 = vadd.f32 %v1064_v34, %v997_v27  ;;  %v1520_v27 = vld [vmem:[#allocation2 + $0x7f0] sm:$0xff]  ;;  %v1485_v34 = vld [vmem:[#allocation2 + $0x708] sm:$0xff] }
 0x3de   :  { %v1077_v38 = vmul.f32 %v1916_v32, %v1070_v33  ;;  %v3361_v29 = vpack.c.bf16 %v1521_v28, %v1520_v27  ;;  %v3301_v32 = vpack.c.bf16 %v1290_v31, %v1289_v30  ;;  %v1484_v33 = vld [vmem:[#allocation2 + $0x700] sm:$0xff]  ;;  %v1495_v30 = vld [vmem:[#allocation2 + $0x758] sm:$0xff] }
 0x3df   :  { %v1076_v47 = vmul.f32 %v1915_v35, %v1065_v36  ;;  %v3365_v35 = vpack.c.bf16 %v1485_v34, %v1484_v33  ;;  %v1101_v36 = vsub.s32 5, %v3591_v45  ;;  %v1301_v31 = vld [vmem:[#allocation2 + $0x660] sm:$0xff] }
 0x3e0   :  { %v1079_v40 = vadd.f32 %v1077_v38, %v969_v37  ;;  %v3683_v37 = vld [vmem:[#allocation4 + $0x8] sm:$0xff] }
 0x3e1   :  { %v1078_v41 = vadd.f32 %v1076_v47, %v964_v39  ;;  %v1203_v38 = vrot.slane %v3683_v37, %v1101_v36  ;;  %v3686_v47 = vld [vmem:[#allocation4] sm:$0xff] }
 0x3e2   :  { %v1081_v43 = vmax.f32 %v1079_v40, 0.0  ;;  %v1102_v40 = vrot.slane %v3686_v47, %v1101_v36  ;;  %v1497_v36 = vld [vmem:[#allocation2 + $0x768] sm:$0xff] }
 0x3e3   :  { %v1080_v49 = vmax.f32 %v1078_v41, 0.0 }
 0x3e4   :  { %v1182_v56 = vmul.f32 %v1918_v46, %v1081_v43  ;;  %v1919_v46 = vld [vmem:[%s3749_s4 + $0xb0] sm:$0xff] }
 0x3e5   :  { %2637 = vmatprep.mubr.f32.mxu0 %v1080_v49  ;;  %v1181_v53 = vmul.f32 %v1917_v44, %v1080_v49 }
 0x3e6   :  { %2638 = vmatmul.mubr.f32.vlgmr.msra.gmra.mrb[10].mxu0 %v1081_v43 }
 0x3e7   :  { %2672 = vmatprep.mubr.f32.mxu1 %v1181_v53  ;;  %3272 = vmatpush3.bf16.msra.mxu0 %v3269_v23  ;;  %v3357_v23 = vpack.c.bf16 %v1519_v22, %v1518_v21 }
 0x3e8   :  { %2673 = vmatmul.mubr.f32.vlgmr.msra.gmra.mrb[10].mxu1 %v1182_v56  ;;  %3274 = vmatprep.subr.bf16.mxu0 %v3273_v52  ;;  %v1291_v56 = vld [vmem:[#allocation2 + $0x610] sm:$0xff] }
 0x3e9   :  { %3336 = vmatpush3.bf16.msra.mxu1 %v3333_v25  ;;  %v1321_v25 = vld [vmem:[#allocation2 + $0x6f8] sm:$0xff] }
 0x3ea   :  { %3338 = vmatprep.subr.bf16.mxu1 %v3337_v57  ;;  %v3297_v26 = vpack.c.bf16 %v1321_v25, %v1320_v24  ;;  %v1493_v24 = vld [vmem:[#allocation2 + $0x748] sm:$0xff]  ;;  %v1299_v25 = vld [vmem:[#allocation2 + $0x650] sm:$0xff] }
 0x3eb   :  { %3276 = vmatpush3.bf16.msra.mxu0 %v3273_v52 }
 0x3ec   :  { %3278 = vmatprep.subr.bf16.mxu0 %v3277_v61 }
 0x3ed   :  { %3340 = vmatpush3.bf16.msra.mxu1 %v3337_v57  ;;  %v1292_v57 = vld [vmem:[#allocation2 + $0x618] sm:$0xff] }
 0x3ee   :  { %3342 = vmatprep.subr.bf16.mxu1 %v3341_v60 }
 0x3ef   :  { %3280 = vmatpush3.bf16.msra.mxu0 %v3277_v61 }
 0x3f0   :  { %3282 = vmatprep.subr.bf16.mxu0 %v3281_v2 }
 0x3f1   :  { %3344 = vmatpush3.bf16.msra.mxu1 %v3341_v60  ;;  %v3305_v60 = vpack.c.bf16 %v1292_v57, %v1291_v56  ;;  %v1922_v56 = vld [vmem:[%s3749_s4 + $0xc8] sm:$0xff] }
 0x3f2   :  { %3346 = vmatprep.subr.bf16.mxu1 %v3345_v5 }
 0x3f3   :  { %3284 = vmatpush3.bf16.msra.mxu0 %v3281_v2 }
 0x3f4   :  { %3286 = vmatprep.subr.bf16.mxu0 %v3285_v8 }
 0x3f5   :  { %3348 = vmatpush3.bf16.msra.mxu1 %v3345_v5  ;;  %v1294_v5 = vld [vmem:[#allocation2 + $0x628] sm:$0xff] }
 0x3f6   :  { %3350 = vmatprep.subr.bf16.mxu1 %v3349_v9  ;;  %v3309_v13 = vpack.c.bf16 %v1294_v5, %v1293_v4  ;;  %v3437_v4 = vpack.c.bf16 %v1792_v1, %v1791_v0 }
 0x3f7   :  { %3288 = vmatpush3.bf16.msra.mxu0 %v3285_v8  ;;  %v1481_v8 = vmul.f32 %v1921_v3, %v668_v63  ;;  %v1693_v3 = vld [vmem:[#allocation2 + $0x838] sm:$0xff] }
 0x3f8   :  { %3290 = vmatprep.subr.bf16.mxu0 %v3289_v14 }
 0x3f9   :  { %3352 = vmatpush3.bf16.msra.mxu1 %v3349_v9  ;;  %v1488_v9 = vld [vmem:[#allocation2 + $0x720] sm:$0xff] }
 0x3fa   :  { %3354 = vmatprep.subr.bf16.mxu1 %v3353_v17  ;;  %v3373_v15 = vpack.c.bf16 %v1489_v10, %v1488_v9 }
 0x3fb   :  { %3292 = vmatpush3.bf16.msra.mxu0 %v3289_v14  ;;  %v1296_v14 = vld [vmem:[#allocation2 + $0x638] sm:$0xff] }
 0x3fc   :  { %3294 = vmatprep.subr.bf16.mxu0 %v3293_v20  ;;  %v3313_v16 = vpack.c.bf16 %v1296_v14, %v1295_v11  ;;  %v1795_v11 = vld [vmem:[#allocation2 + $0x8c0] sm:$0xff]  ;;  %v1796_v14 = vld [vmem:[#allocation2 + $0x8c8] sm:$0xff] }
 0x3fd   :  { %3356 = vmatpush3.bf16.msra.mxu1 %v3353_v17  ;;  %v1490_v17 = vld [vmem:[#allocation2 + $0x730] sm:$0xff] }
 0x3fe   :  { %3358 = vmatprep.subr.bf16.mxu1 %v3357_v23  ;;  %v3377_v21 = vpack.c.bf16 %v1491_v18, %v1490_v17  ;;  %v3445_v17 = vpack.c.bf16 %v1796_v14, %v1795_v11 }
 0x3ff   :  { %3296 = vmatpush3.bf16.msra.mxu0 %v3293_v20  ;;  %v1298_v20 = vld [vmem:[#allocation2 + $0x648] sm:$0xff] }
 0x400   :  { %3298 = vmatprep.subr.bf16.mxu0 %v3297_v26  ;;  %v3317_v22 = vpack.c.bf16 %v1298_v20, %v1297_v19  ;;  %v1797_v19 = vld [vmem:[#allocation2 + $0x8d0] sm:$0xff]  ;;  %v1798_v20 = vld [vmem:[#allocation2 + $0x8d8] sm:$0xff] }
 0x401   :  { %3360 = vmatpush3.bf16.msra.mxu1 %v3357_v23  ;;  %v1492_v23 = vld [vmem:[#allocation2 + $0x740] sm:$0xff] }
 0x402   :  { %3362 = vmatprep.subr.bf16.mxu1 %v3361_v29  ;;  %v3381_v27 = vpack.c.bf16 %v1493_v24, %v1492_v23  ;;  %v1699_v23 = vld [vmem:[#allocation2 + $0x868] sm:$0xff] }
 0x403   :  { %3300 = vmatpush3.bf16.msra.mxu0 %v3297_v26  ;;  %v1300_v26 = vld [vmem:[#allocation2 + $0x658] sm:$0xff] }
 0x404   :  { %3302 = vmatprep.subr.bf16.mxu0 %v3301_v32  ;;  %v3321_v28 = vpack.c.bf16 %v1300_v26, %v1299_v25  ;;  %v1799_v25 = vld [vmem:[#allocation2 + $0x8e0] sm:$0xff]  ;;  %v1800_v26 = vld [vmem:[#allocation2 + $0x8e8] sm:$0xff] }
 0x405   :  { %3364 = vmatpush3.bf16.msra.mxu1 %v3361_v29  ;;  %v1494_v29 = vld [vmem:[#allocation2 + $0x750] sm:$0xff] }
 0x406   :  { %3366 = vmatprep.subr.bf16.mxu1 %v3365_v35  ;;  %v3385_v33 = vpack.c.bf16 %v1495_v30, %v1494_v29  ;;  %v1701_v29 = vld [vmem:[#allocation2 + $0x878] sm:$0xff] }
 0x4b9   :  { %v2639_v39 = vpop.f32.mrb[10].mxu0 }
 0x4ba   :  { %v1169_v41 = vpop.f32.mrb[11].mxu0  ;;  %v1175_v50 = vadd.f32 %v2639_v39, %v1102_v40  ;;  %v1304_v39 = vld [vmem:[#allocation2 + $0x678] sm:$0xff] }
 0x4bb   :  { %v2674_v48 = vpop.f32.mrb[10].mxu1  ;;  %v1170_v52 = vadd.f32 %v1169_v41, %v1102_v40 }
 0x4bc   :  { %v1276_v43 = vadd.f32 %v2674_v48, %v1203_v38  ;;  %v1270_v44 = vpop.f32.mrb[11].mxu1  ;;  %v1498_v48 = vld [vmem:[#allocation2 + $0x770] sm:$0xff] }
 0x4bd   :  { %v1271_v49 = vadd.f32 %v1270_v44, %v1203_v38  ;;  %v1303_v38 = vld [vmem:[#allocation2 + $0x670] sm:$0xff]  ;;  %v1687_v44 = vld [vmem:[#allocation2 + $0x808] sm:$0xff] }
 0x4be   :  { %v1283_v51 = vmul.f32 %v1920_v42, %v1276_v43  ;;  %v3329_v41 = vpack.c.bf16 %v1304_v39, %v1303_v38  ;;  %v1499_v42 = vld [vmem:[#allocation2 + $0x778] sm:$0xff]  ;;  %v1686_v43 = vld [vmem:[#allocation2 + $0x800] sm:$0xff] }
 0x4bf   :  { %v1282_v53 = vmul.f32 %v1919_v46, %v1271_v49  ;;  %v3393_v46 = vpack.c.bf16 %v1499_v42, %v1498_v48  ;;  %v3397_v49 = vpack.c.bf16 %v1687_v44, %v1686_v43  ;;  %v1925_v43 = vld [vmem:[%s3749_s4 + $0xe0] sm:$0xff] }
 0x4c0   :  { %v1285_v54 = vadd.f32 %v1283_v51, %v1175_v50  ;;  %v1787_v50 = vld [vmem:[#allocation2 + $0x880] sm:$0xff]  ;;  %v1788_v51 = vld [vmem:[#allocation2 + $0x888] sm:$0xff] }
 0x4c1   :  { %v1284_v55 = vadd.f32 %v1282_v53, %v1170_v52  ;;  %v1688_v52 = vld [vmem:[#allocation2 + $0x810] sm:$0xff]  ;;  %v1689_v53 = vld [vmem:[#allocation2 + $0x818] sm:$0xff] }
 0x4c2   :  { %v1287_v58 = vmax.f32 %v1285_v54, 0.0  ;;  %v669_v54 = vmax.f32 %v3648_v12, 0.0  ;;  %v3401_v57 = vpack.c.bf16 %v1689_v53, %v1688_v52  ;;  %v1927_v53 = vld [vmem:[%s3749_s4 + $0xf0] sm:$0xff] }
 0x4c3   :  { %v1286_v61 = vmax.f32 %v1284_v55, 0.0  ;;  %v3429_v55 = vpack.c.bf16 %v1788_v51, %v1787_v50 }
 0x4c4   :  { %v1504_v6 = vmul.f32 %v1924_v62, %v1287_v58  ;;  %v1691_v62 = vld [vmem:[#allocation2 + $0x828] sm:$0xff] }
 0x4c5   :  { %2707 = vmatprep.mubr.f32.mxu0 %v1286_v61  ;;  %v1503_v2 = vmul.f32 %v1923_v59, %v1286_v61  ;;  %v1789_v59 = vld [vmem:[#allocation2 + $0x890] sm:$0xff]  ;;  %v1690_v61 = vld [vmem:[#allocation2 + $0x820] sm:$0xff] }
 0x4c6   :  { %2708 = vmatmul.mubr.f32.vlgmr.msra.gmra.mrb[12].mxu0 %v1287_v58  ;;  %v1790_v58 = vld [vmem:[#allocation2 + $0x898] sm:$0xff]  ;;  %v3405_v12 = vpack.c.bf16 %v1691_v62, %v1690_v61 }
 0x4c7   :  { %3304 = vmatpush3.bf16.msra.mxu0 %v3301_v32  ;;  %2742 = vmatprep.mubr.f32.mxu0 %v668_v63  ;;  %v1302_v32 = vld [vmem:[#allocation2 + $0x668] sm:$0xff]  ;;  %v1482_v63 = vmul.f32 %v1922_v56, %v669_v54 }
 0x4c8   :  { %2777 = vmatprep.mubr.f32.mxu1 %v1503_v2  ;;  %3306 = vmatprep.subr.bf16.mxu0 %v3305_v60  ;;  %v3325_v34 = vpack.c.bf16 %v1302_v32, %v1301_v31  ;;  %v1692_v2 = vld [vmem:[#allocation2 + $0x830] sm:$0xff]  ;;  %v1802_v32 = vld [vmem:[#allocation2 + $0x8f8] sm:$0xff] }
 0x4c9   :  { %2778 = vmatmul.mubr.f32.vlgmr.msra.gmra.mrb[12].mxu1 %v1504_v6  ;;  %v3409_v5 = vpack.c.bf16 %v1693_v3, %v1692_v2  ;;  %v1793_v6 = vld [vmem:[#allocation2 + $0x8b0] sm:$0xff]  ;;  %v1929_v2 = vld [vmem:[%s3749_s4 + $0x100] sm:$0xff] }
 0x4ca   :  { %3368 = vmatpush3.bf16.msra.mxu1 %v3365_v35  ;;  %2812 = vmatprep.mubr.f32.mxu1 %v1481_v8  ;;  %v1496_v35 = vld [vmem:[#allocation2 + $0x760] sm:$0xff]  ;;  %v1801_v31 = vld [vmem:[#allocation2 + $0x8f0] sm:$0xff] }
 0x4cb   :  { %3308 = vmatpush3.bf16.msra.mxu0 %v3305_v60  ;;  %3370 = vmatprep.subr.bf16.mxu1 %v3369_v7  ;;  %v3389_v40 = vpack.c.bf16 %v1497_v36, %v1496_v35  ;;  %v3433_v60 = vpack.c.bf16 %v1790_v58, %v1789_v59  ;;  %v1694_v8 = vld [vmem:[#allocation2 + $0x840] sm:$0xff]  ;;  %v1704_v59 = vsub.s32 7, %v3591_v45 }
 0x4cc   :  { %3310 = vmatprep.subr.bf16.mxu0 %v3309_v13 }
 0x4cd   :  { %v1806_v58 = vrot.slane %v3683_v37, %v1704_v59  ;;  %v1705_v62 = vrot.slane %v3686_v47, %v1704_v59 }
 0x4ce   :  { %3372 = vmatpush3.bf16.msra.mxu1 %v3369_v7  ;;  %v1794_v7 = vld [vmem:[#allocation2 + $0x8b8] sm:$0xff] }
 0x4cf   :  { %3312 = vmatpush3.bf16.msra.mxu0 %v3309_v13  ;;  %3374 = vmatprep.subr.bf16.mxu1 %v3373_v15  ;;  %v1695_v13 = vld [vmem:[#allocation2 + $0x848] sm:$0xff]  ;;  %v3441_v9 = vpack.c.bf16 %v1794_v7, %v1793_v6 }
 0x4d0   :  { %3314 = vmatprep.subr.bf16.mxu0 %v3313_v16  ;;  %v3413_v10 = vpack.c.bf16 %v1695_v13, %v1694_v8  ;;  %v3472_v13 = vld [vmem:[%s3745_s0] sm:$0xff] }
 0x4d2   :  { %3376 = vmatpush3.bf16.msra.mxu1 %v3373_v15  ;;  %v1696_v15 = vld [vmem:[#allocation2 + $0x850] sm:$0xff] }
 0x4d3   :  { %3316 = vmatpush3.bf16.msra.mxu0 %v3313_v16  ;;  %3378 = vmatprep.subr.bf16.mxu1 %v3377_v21  ;;  %v1697_v16 = vld [vmem:[#allocation2 + $0x858] sm:$0xff] }
 0x4d4   :  { %3318 = vmatprep.subr.bf16.mxu0 %v3317_v22  ;;  %v3417_v18 = vpack.c.bf16 %v1697_v16, %v1696_v15 }
 0x4d6   :  { %3380 = vmatpush3.bf16.msra.mxu1 %v3377_v21  ;;  %v3449_v21 = vpack.c.bf16 %v1798_v20, %v1797_v19 }
 0x4d7   :  { %3320 = vmatpush3.bf16.msra.mxu0 %v3317_v22  ;;  %3382 = vmatprep.subr.bf16.mxu1 %v3381_v27  ;;  %v1698_v22 = vld [vmem:[#allocation2 + $0x860] sm:$0xff] }
 0x4d8   :  { %3322 = vmatprep.subr.bf16.mxu0 %v3321_v28  ;;  %v3421_v24 = vpack.c.bf16 %v1699_v23, %v1698_v22 }
 0x4da   :  { %3384 = vmatpush3.bf16.msra.mxu1 %v3381_v27  ;;  %v3453_v27 = vpack.c.bf16 %v1800_v26, %v1799_v25 }
 0x4db   :  { %3324 = vmatpush3.bf16.msra.mxu0 %v3321_v28  ;;  %3386 = vmatprep.subr.bf16.mxu1 %v3385_v33  ;;  %v1700_v28 = vld [vmem:[#allocation2 + $0x870] sm:$0xff] }
 0x4dc   :  { %3326 = vmatprep.subr.bf16.mxu0 %v3325_v34  ;;  %v3425_v30 = vpack.c.bf16 %v1701_v29, %v1700_v28 }
 0x4de   :  { %3388 = vmatpush3.bf16.msra.mxu1 %v3385_v33  ;;  %v3457_v33 = vpack.c.bf16 %v1802_v32, %v1801_v31 }
 0x4df   :  { %3328 = vmatpush3.bf16.msra.mxu0 %v3325_v34  ;;  %3390 = vmatprep.subr.bf16.mxu1 %v3389_v40  ;;  %v1474_v34 = vsub.s32 6, %v3591_v45 }
 0x4e0   :  { %3330 = vmatprep.subr.bf16.mxu0 %v3329_v41 }
 0x4e1   :  { %v1675_v36 = vrot.slane %v3683_v37, %v1474_v34  ;;  %v1475_v39 = vrot.slane %v3686_v47, %v1474_v34  ;;  %v3471_v47 = vld [vmem:[%s3745_s0 + $0x8] sm:$0xff] }
 0x4e2   :  { %3392 = vmatpush3.bf16.msra.mxu1 %v3389_v40 }
 0x4e3   :  { %3332 = vmatpush3.bf16.msra.mxu0 %v3329_v41  ;;  %3394 = vmatprep.subr.bf16.mxu1 %v3393_v46  ;;  %v1926_v41 = vld [vmem:[%s3749_s4 + $0xe8] sm:$0xff] }
 0x4e4   :  { %3398 = vmatprep.subr.bf16.mxu0 %v3397_v49 }
 0x4e6   :  { %3396 = vmatpush3.bf16.msra.mxu1 %v3393_v46  ;;  %2743 = vmatmul.mubr.f32.vlgmr.msra.gmra.mrb[12].mxu0 %v669_v54  ;;  %v1928_v54 = vld [vmem:[%s3749_s4 + $0xf8] sm:$0xff] }
 0x4e7   :  { %3400 = vmatpush3.bf16.msra.mxu0 %v3397_v49  ;;  %3430 = vmatprep.subr.bf16.mxu1 %v3429_v55 }
 0x4e8   :  { %3402 = vmatprep.subr.bf16.mxu0 %v3401_v57 }
 0x4e9   :  { %2813 = vmatmul.mubr.f32.vlgmr.msra.gmra.mrb[12].mxu1 %v1482_v63 }
 0x4ea   :  { %3432 = vmatpush3.bf16.msra.mxu1 %v3429_v55 }
 0x4eb   :  { %3404 = vmatpush3.bf16.msra.mxu0 %v3401_v57  ;;  %3434 = vmatprep.subr.bf16.mxu1 %v3433_v60 }
 0x4ec   :  { %3406 = vmatprep.subr.bf16.mxu0 %v3405_v12 }
 0x4ee   :  { %3436 = vmatpush3.bf16.msra.mxu1 %v3433_v60 }
 0x4ef   :  { %3408 = vmatpush3.bf16.msra.mxu0 %v3405_v12  ;;  %3438 = vmatprep.subr.bf16.mxu1 %v3437_v4  ;;  %v1930_v12 = vld [vmem:[%s3749_s4 + $0x108] sm:$0xff] }
 0x4f0   :  { %3410 = vmatprep.subr.bf16.mxu0 %v3409_v5 }
 0x4f2   :  { %3440 = vmatpush3.bf16.msra.mxu1 %v3437_v4 }
 0x4f3   :  { %3412 = vmatpush3.bf16.msra.mxu0 %v3409_v5  ;;  %3442 = vmatprep.subr.bf16.mxu1 %v3441_v9 }
 0x4f4   :  { %3414 = vmatprep.subr.bf16.mxu0 %v3413_v10 }
 0x4f6   :  { %3444 = vmatpush3.bf16.msra.mxu1 %v3441_v9 }
 0x4f7   :  { %3416 = vmatpush3.bf16.msra.mxu0 %v3413_v10  ;;  %3446 = vmatprep.subr.bf16.mxu1 %v3445_v17 }
 0x4f8   :  { %3418 = vmatprep.subr.bf16.mxu0 %v3417_v18 }
 0x4fa   :  { %3448 = vmatpush3.bf16.msra.mxu1 %v3445_v17 }
 0x4fb   :  { %3420 = vmatpush3.bf16.msra.mxu0 %v3417_v18  ;;  %3450 = vmatprep.subr.bf16.mxu1 %v3449_v21 }
 0x4fc   :  { %3422 = vmatprep.subr.bf16.mxu0 %v3421_v24 }
 0x4fe   :  { %3452 = vmatpush3.bf16.msra.mxu1 %v3449_v21 }
 0x4ff   :  { %3424 = vmatpush3.bf16.msra.mxu0 %v3421_v24  ;;  %3454 = vmatprep.subr.bf16.mxu1 %v3453_v27 }
 0x500   :  { %3426 = vmatprep.subr.bf16.mxu0 %v3425_v30 }
 0x502   :  { %3456 = vmatpush3.bf16.msra.mxu1 %v3453_v27 }
 0x503   :  { %3428 = vmatpush3.bf16.msra.mxu0 %v3425_v30  ;;  %3458 = vmatprep.subr.bf16.mxu1 %v3457_v33 }
 0x506   :  { %3460 = vmatpush3.bf16.msra.mxu1 %v3457_v33 }
 0x5b9   :  { %v2744_v35 = vpop.f32.mrb[12].mxu0 }
 0x5ba   :  { %v1463_v38 = vpop.f32.mrb[13].mxu0  ;;  %v1477_v46 = vadd.f32 %v2744_v35, %v1475_v39 }
 0x5bb   :  { %v1476_v50 = vadd.f32 %v1475_v39, %v1463_v38 }
 0x5bc   :  { %v2814_v40 = vpop.f32.mrb[12].mxu1 }
 0x5bd   :  { %v1677_v48 = vadd.f32 %v2814_v40, %v1675_v36  ;;  %v1663_v42 = vpop.f32.mrb[13].mxu1 }
 0x5be   :  { %v1676_v44 = vadd.f32 %v1675_v36, %v1663_v42 }
 0x5bf   :  { %v1682_v49 = vmul.f32 %v1926_v41, %v1677_v48 }
 0x5c0   :  { %v1681_v51 = vmul.f32 %v1925_v43, %v1676_v44 }
 0x5c1   :  { %v1684_v52 = vadd.f32 %v1682_v49, %v1477_v46 }
 0x5c2   :  { %v1683_v55 = vadd.f32 %v1681_v51, %v1476_v50 }
 0x5c3   :  { %v1785_v57 = vmul.f32 %v1928_v54, %v1684_v52 }
 0x5c4   :  { %2847 = vmatprep.mubr.f32.mxu0 %v1683_v55  ;;  %v1784_v56 = vmul.f32 %v1927_v53, %v1683_v55 }
 0x5c5   :  { %2848 = vmatmul.mubr.f32.vlgmr.msra.gmra.mrb[14].mxu0 %v1684_v52 }
 0x5c6   :  { %2882 = vmatprep.mubr.f32.mxu1 %v1784_v56 }
 0x5c7   :  { %2883 = vmatmul.mubr.f32.vlgmr.msra.gmra.mrb[14].mxu1 %v1785_v57 }
 0x698   :  { %v2849_v61 = vpop.f32.mrb[14].mxu0 }
 0x699   :  { %v1772_v63 = vpop.f32.mrb[15].mxu0  ;;  %v1778_v4 = vadd.f32 %v2849_v61, %v1705_v62 }
 0x69a   :  { %v2884_v60 = vpop.f32.mrb[14].mxu1  ;;  %v1773_v5 = vadd.f32 %v1772_v63, %v1705_v62 }
 0x69b   :  { %v1879_v0 = vadd.f32 %v2884_v60, %v1806_v58  ;;  %v1873_v1 = vpop.f32.mrb[15].mxu1 }
 0x69c   :  { %v1874_v3 = vadd.f32 %v1873_v1, %v1806_v58 }
 0x69d   :  { %v1886_v45 = vmul.f32 %v1930_v12, %v1879_v0 }
 0x69e   :  { %v1885_v37 = vmul.f32 %v1929_v2, %v1874_v3 }
 0x69f   :  { %v1888_v6 = vadd.f32 %v1886_v45, %v1778_v4 }
 0x6a0   :  { %v1887_v7 = vadd.f32 %v1885_v37, %v1773_v5 }
 0x6a1   :  { %v1890_v8 = vadd.f32 %v3471_v47, %v1888_v6 }
 0x6a2   :  { %v1889_v9 = vadd.f32 %v3472_v13, %v1887_v7 }
 0x6a3   :  { %1892 = vst [vmem:[%s3750_s5 + $0x8] sm:$0xff] %v1890_v8 }
 0x6a4   :  { %1891 = vst [vmem:[%s3750_s5] sm:$0xff] %v1889_v9 }
 0x6a5   :  { %1897 = vsyncpa [#allocation3], 1 }
 0x6a6   :  { %1898 = vsyncpa [#allocation5], 1 }

</bundles_post_ra>
